<compile_context>
chip_gen: v7x
topology: tpu7x:2x2x1
jax: 0.10.0
libtpu: 0.0.40
codegen_flags: <defaults>
</compile_context>

<pallas_src>
import jax
import jax.numpy as jnp
from jax.experimental import pallas as pl
from jax.experimental.pallas import tpu as pltpu

KH = KW = 3                    # kernel size (padding=1, stride=1)
_MAX_STATIC_STRIPS = 16        # unroll interior strips statically up to this count
_ACC_BUDGET_ELEMS = 16 * 1024  # ~16 f32 vregs live for the strip accumulator


def _make_dwconv_kernel(sh):
    """Returns a kernel closure with interior-strip height `sh` baked in."""

    def kernel(x_ref, w_ref, b_ref, o_ref, xl_ref, xr_ref):
        # x_ref : (H, W, Ct)   input tile, channels on the lane axis
        # w_ref : (3, 3, Ct)   per-channel 3x3 filters (channel-last)
        # b_ref : (1, 1, Ct)   per-channel bias
        # o_ref : (H, W, Ct)   output tile
        # xl_ref/xr_ref : (H, W, Ct) scratch: x shifted along W by +1 / -1
        H, W, Ct = o_ref.shape
        f32 = jnp.float32

        # --- W halo: shifted copies built once per tile (XLU roll, aligned
        # full-width stores); the single wrapped column is re-zeroed afterwards.
        xl_ref[...] = pltpu.roll(x_ref[...], 1, 1)        # xl[:, w] = x[:, w-1]
        xr_ref[...] = pltpu.roll(x_ref[...], W - 1, 1)    # xr[:, w] = x[:, w+1]
        zcol = jnp.zeros((H, 1, Ct), x_ref.dtype)
        xl_ref[:, 0:1, :] = zcol
        xr_ref[:, W - 1:W, :] = zcol

        # --- per-tap weights / bias hoisted out of the hot loops.
        w9 = w_ref[...].astype(f32)                        # (3, 3, Ct)
        wt = [[w9[kh:kh + 1, kw:kw + 1, :] for kw in range(KW)]
              for kh in range(KH)]
        bias = b_ref[...].astype(f32)                      # (1, 1, Ct)
        srcs = (xl_ref, x_ref, xr_ref)                     # kw = 0, 1, 2

        def add_taps(acc, kh, s0, nrows):
            # taps (kh, 0..2) read source rows [s0, s0+nrows) of the 3 planes.
            for kw in range(KW):
                acc = acc + wt[kh][kw] * srcs[kw][pl.ds(s0, nrows), :, :].astype(f32)
            return acc

        def border_strip(r0, nrows):
            # Strip with image-top/bottom clipping (static r0/nrows only).
            acc = jnp.broadcast_to(bias, (nrows, W, Ct))
            for kh in range(KH):
                dh = kh - 1
                lo, hi = max(r0, -dh), min(r0 + nrows, H - dh)
                if hi <= lo:
                    continue                               # tap fully off-image
                assert lo == r0 and hi == r0 + nrows       # strips never straddle
                acc = add_taps(acc, kh, r0 + dh, nrows)
            o_ref[pl.ds(r0, nrows), :, :] = acc.astype(o_ref.dtype)

        def interior_strip(r0, nrows):
            # rows [r0, r0+nrows) with 1 <= r0 and r0+nrows <= H-1: all 9 taps valid.
            acc = jnp.broadcast_to(bias, (nrows, W, Ct))
            for kh in range(KH):
                acc = add_taps(acc, kh, r0 + kh - 1, nrows)
            o_ref[pl.ds(r0, nrows), :, :] = acc.astype(o_ref.dtype)

        # --- strip schedule: border rows special-cased, interior strip-mined so
        # the accumulator strip stays resident in vregs (never a full-plane acc).
        border_strip(0, 1)
        if H >= 2:
            interior = H - 2
            n_full, rem = divmod(interior, sh) if interior > 0 else (0, 0)
            if n_full > 0:
                if n_full <= _MAX_STATIC_STRIPS:
                    for i in range(n_full):
                        interior_strip(1 + i * sh, sh)
                else:
                    @pl.loop(0, n_full)
                    def _(i):
                        interior_strip(1 + i * sh, sh)
            if rem > 0:
                interior_strip(1 + n_full * sh, rem)
            border_strip(H - 1, 1)

    return kernel


def _vmem_capacity_bytes():
    try:
        return int(pltpu.get_tpu_info().vmem_capacity_bytes)
    except Exception:
        return 64 * 1024 * 1024   # conservative (v7x-sized) fallback


def dwise_forward_nhwc(x_nhwc, weight, bias):
    """Depthwise 3x3 conv, stride 1, padding 1, groups=C, channel-last input.

    x_nhwc: (N, H, W, C); weight: (C, 1, 3, 3); bias: (C,)  ->  (N, H, W, C)
    """
    N, H, W, C = x_nhwc.shape
    itemsize = jnp.dtype(x_nhwc.dtype).itemsize

    w_hwc = jnp.transpose(weight.reshape(C, KH, KW), (1, 2, 0))     # (3, 3, C)
    b_c = bias.reshape(1, 1, C)                                     # (1, 1, C)

    # --- generation-aware VMEM budgeting ------------------------------------
    vmem_cap = _vmem_capacity_bytes()
    budget = min(int(0.5 * vmem_cap), 64 * 1024 * 1024)
    w_itemsize = jnp.dtype(weight.dtype).itemsize

    def vmem_need(ct):
        plane = H * W * ct * itemsize
        params = 2 * (KH * KW + 1) * ct * w_itemsize
        # 2x double-buffered in + out blocks, 2 shifted-plane scratches, params.
        return 4 * plane + 2 * plane + params

    if C <= 128:
        # TODO(synk): small-C path that packs W sub-tiles into the 128-lane axis
        # when C << 128 (the C=4 self-test runs in the masked-store regime).
        c_tile = C
    else:
        c_tile = min(512, (C // 128) * 128)
        while c_tile > 128 and vmem_need(c_tile) > budget:
            c_tile -= 128
    num_ct = pl.cdiv(C, c_tile)
    # TODO(synk): add a parallel H-strip grid axis (1-row halo) for planes where
    # even c_tile=128 blocks exceed the budget (very large H*W on v7x's 64 MiB).

    need = vmem_need(c_tile)
    vmem_limit = min(int(0.9 * vmem_cap), max(need + 16 * 1024 * 1024,
                                              32 * 1024 * 1024))
    vmem_limit = max(vmem_limit, need + 2 * 1024 * 1024)

    # interior strip height: keep the f32 accumulator strip at <= ~16 vregs.
    sh = max(1, min(max(H - 2, 1), _ACC_BUDGET_ELEMS // max(W * c_tile, 1)))

    sq = pl.Squeezed()
    grid_spec = pltpu.PrefetchScalarGridSpec(
        num_scalar_prefetch=0,
        grid=(N, num_ct),
        in_specs=[
            # full spatial plane, one channel tile, per (n, c) step
            pl.BlockSpec((sq, H, W, c_tile), lambda n, c: (n, 0, 0, c)),
            # (3, 3, Ct) filter slab for this channel tile
            pl.BlockSpec((KH, KW, c_tile), lambda n, c: (0, 0, c)),
            # per-channel bias for this channel tile
            pl.BlockSpec((1, 1, c_tile), lambda n, c: (0, 0, c)),
        ],
        out_specs=pl.BlockSpec((sq, H, W, c_tile), lambda n, c: (n, 0, 0, c)),
        scratch_shapes=[
            pltpu.VMEM((H, W, c_tile), x_nhwc.dtype),   # x shifted: col w-1
            pltpu.VMEM((H, W, c_tile), x_nhwc.dtype),   # x shifted: col w+1
        ],
    )

    return pl.pallas_call(
        _make_dwconv_kernel(sh),
        out_shape=jax.ShapeDtypeStruct((N, H, W, C), x_nhwc.dtype),
        grid_spec=grid_spec,
        compiler_params=pltpu.CompilerParams(
            dimension_semantics=("parallel", "parallel"),
            vmem_limit_bytes=int(vmem_limit)),
    )(x_nhwc, w_hwc, b_c)


def dwise_forward(x, weight, bias):
    """PyTorch-layout entry point: x (N, C, H, W) -> (N, C, H, W)."""
    # TODO(synk): these two transposes are full HBM passes; in an NHWC pipeline
    # call dwise_forward_nhwc directly and drop them (largest remaining
    # wall-clock cost on v5e/v6e where this op is HBM-bound).
    x_nhwc = jnp.transpose(x, (0, 2, 3, 1))                         # (N, H, W, C)
    out_nhwc = dwise_forward_nhwc(x_nhwc, weight, bias)
    return jnp.transpose(out_nhwc, (0, 3, 1, 2))                    # back to NCHW


def _reference(x, weight, bias):
    # Pure-JAX depthwise conv reference (XLA) for correctness checks.
    C = x.shape[1]
    out = jax.lax.conv_general_dilated(
        x, weight,
        window_strides=(1, 1),
        padding=((1, 1), (1, 1)),
        dimension_numbers=("NCHW", "OIHW", "NCHW"),
        feature_group_count=C)
    return out + bias.reshape(1, C, 1, 1)


if __name__ == "__main__":
    key = jax.random.PRNGKey(0)
    kx, kw, kb = jax.random.split(key, 3)

    # --- mandated small-shape test (masked-lane regime, single channel tile) ---
    N, C, H, W = 2, 4, 16, 16
    x = jax.random.normal(kx, (N, C, H, W), dtype=jnp.float32)
    weight = jax.random.normal(kw, (C, 1, KH, KW), dtype=jnp.float32) * 0.1
    bias = jax.random.normal(kb, (C,), dtype=jnp.float32) * 0.1

    out = jax.block_until_ready(dwise_forward(x, weight, bias))
    ref = _reference(x, weight, bias)
    assert out.shape == (N, C, H, W)
    assert jnp.allclose(out, ref, atol=1e-5, rtol=1e-5), "mismatch vs reference (small)"

    # --- lane-dense / multi-channel-tile test (C > 128, non-multiple of 128) ---
    N2, C2, H2, W2 = 1, 192, 24, 24
    x2 = jax.random.normal(kx, (N2, C2, H2, W2), dtype=jnp.float32)
    w2 = jax.random.normal(kw, (C2, 1, KH, KW), dtype=jnp.float32) * 0.1
    b2 = jax.random.normal(kb, (C2,), dtype=jnp.float32) * 0.1

    out2 = jax.block_until_ready(dwise_forward(x2, w2, b2))
    ref2 = _reference(x2, w2, b2)
    assert out2.shape == (N2, C2, H2, W2)
    assert jnp.allclose(out2, ref2, atol=1e-4, rtol=1e-4), "mismatch vs reference (large)"

    print("KERNEL_OK")
</pallas_src>

<mosaic_0001>
module attributes {stable_mosaic.version = 11 : i64} {
  func.func @kernel(%arg0: i32, %arg1: i32, %arg2: memref<1x16x16x4xf32, #tpu.memory_space<vmem>>, %arg3: memref<3x3x4xf32, #tpu.memory_space<vmem>>, %arg4: memref<1x1x4xf32, #tpu.memory_space<vmem>>, %arg5: memref<1x16x16x4xf32, #tpu.memory_space<vmem>>, %arg6: memref<16x16x4xf32, #tpu.memory_space<vmem>>, %arg7: memref<16x16x4xf32, #tpu.memory_space<vmem>>) attributes {dimension_semantics = [#tpu.dimension_semantics<parallel>, #tpu.dimension_semantics<parallel>], iteration_bounds = array<i64: 2, 1>, scalar_prefetch = 0 : i64, scratch_operands = 2 : i64, tpu.core_type = #tpu.core_type<tc>, window_params = [{transform_indices = @transform_0, window_bounds = array<i64: 1, 16, 16, 4>}, {transform_indices = @transform_1, window_bounds = array<i64: 3, 3, 4>}, {transform_indices = @transform_2, window_bounds = array<i64: 1, 1, 4>}, {transform_indices = @transform_3, window_bounds = array<i64: 1, 16, 16, 4>}]} {
    %c0 = arith.constant 0 : index
    %c0_0 = arith.constant 0 : index
    %c0_1 = arith.constant 0 : index
    %c0_2 = arith.constant 0 : index
    %0 = vector.load %arg2[%c0, %c0_0, %c0_1, %c0_2] : memref<1x16x16x4xf32, #tpu.memory_space<vmem>>, vector<1x16x16x4xf32>
    %1 = vector.shape_cast %0 : vector<1x16x16x4xf32> to vector<16x16x4xf32>
    %c1_i32 = arith.constant 1 : i32
    %2 = tpu.dynamic_rotate %1 by %c1_i32 dim 1 : vector<16x16x4xf32>, i32 -> vector<16x16x4xf32>
    %c0_3 = arith.constant 0 : index
    %c0_4 = arith.constant 0 : index
    %c0_5 = arith.constant 0 : index
    %3 = vector.load %arg6[%c0_3, %c0_4, %c0_5] : memref<16x16x4xf32, #tpu.memory_space<vmem>>, vector<16x16x4xf32>
    tpu.vector_store %arg6[%c0_3, %c0_4, %c0_5], %2 {strides = array<i32>} : memref<16x16x4xf32, #tpu.memory_space<vmem>>, vector<16x16x4xf32>,
    %c0_6 = arith.constant 0 : index
    %c0_7 = arith.constant 0 : index
    %c0_8 = arith.constant 0 : index
    %c0_9 = arith.constant 0 : index
    %4 = vector.load %arg2[%c0_6, %c0_7, %c0_8, %c0_9] : memref<1x16x16x4xf32, #tpu.memory_space<vmem>>, vector<1x16x16x4xf32>
    %5 = vector.shape_cast %4 : vector<1x16x16x4xf32> to vector<16x16x4xf32>
    %c15_i32 = arith.constant 15 : i32
    %6 = tpu.dynamic_rotate %5 by %c15_i32 dim 1 : vector<16x16x4xf32>, i32 -> vector<16x16x4xf32>
    %c0_10 = arith.constant 0 : index
    %c0_11 = arith.constant 0 : index
    %c0_12 = arith.constant 0 : index
    %7 = vector.load %arg7[%c0_10, %c0_11, %c0_12] : memref<16x16x4xf32, #tpu.memory_space<vmem>>, vector<16x16x4xf32>
    tpu.vector_store %arg7[%c0_10, %c0_11, %c0_12], %6 {strides = array<i32>} : memref<16x16x4xf32, #tpu.memory_space<vmem>>, vector<16x16x4xf32>,
    %cst = arith.constant 0.000000e+00 : f32
    %8 = vector.broadcast %cst : f32 to vector<16x1x4xf32>
    %c0_13 = arith.constant 0 : index
    %c0_14 = arith.constant 0 : index
    %c0_15 = arith.constant 0 : index
    %9 = vector.load %arg6[%c0_13, %c0_14, %c0_15] : memref<16x16x4xf32, #tpu.memory_space<vmem>>, vector<16x1x4xf32>
    tpu.vector_store %arg6[%c0_13, %c0_14, %c0_15], %8 {strides = array<i32>} : memref<16x16x4xf32, #tpu.memory_space<vmem>>, vector<16x1x4xf32>,
    %c0_16 = arith.constant 0 : index
    %c15 = arith.constant 15 : index
    %c0_17 = arith.constant 0 : index
    %10 = vector.load %arg7[%c0_16, %c15, %c0_17] : memref<16x16x4xf32, #tpu.memory_space<vmem>>, vector<16x1x4xf32>
    tpu.vector_store %arg7[%c0_16, %c15, %c0_17], %8 {strides = array<i32>} : memref<16x16x4xf32, #tpu.memory_space<vmem>>, vector<16x1x4xf32>,
    %c0_18 = arith.constant 0 : index
    %c0_19 = arith.constant 0 : index
    %c0_20 = arith.constant 0 : index
    %11 = vector.load %arg3[%c0_18, %c0_19, %c0_20] : memref<3x3x4xf32, #tpu.memory_space<vmem>>, vector<3x3x4xf32>
    %12 = vector.extract_strided_slice %11 {offsets = [0, 0, 0], sizes = [1, 1, 4], strides = [1, 1, 1]} : vector<3x3x4xf32> to vector<1x1x4xf32>
    %13 = vector.extract_strided_slice %11 {offsets = [0, 1, 0], sizes = [1, 1, 4], strides = [1, 1, 1]} : vector<3x3x4xf32> to vector<1x1x4xf32>
    %14 = vector.extract_strided_slice %11 {offsets = [0, 2, 0], sizes = [1, 1, 4], strides = [1, 1, 1]} : vector<3x3x4xf32> to vector<1x1x4xf32>
    %15 = vector.extract_strided_slice %11 {offsets = [1, 0, 0], sizes = [1, 1, 4], strides = [1, 1, 1]} : vector<3x3x4xf32> to vector<1x1x4xf32>
    %16 = vector.extract_strided_slice %11 {offsets = [1, 1, 0], sizes = [1, 1, 4], strides = [1, 1, 1]} : vector<3x3x4xf32> to vector<1x1x4xf32>
    %17 = vector.extract_strided_slice %11 {offsets = [1, 2, 0], sizes = [1, 1, 4], strides = [1, 1, 1]} : vector<3x3x4xf32> to vector<1x1x4xf32>
    %18 = vector.extract_strided_slice %11 {offsets = [2, 0, 0], sizes = [1, 1, 4], strides = [1, 1, 1]} : vector<3x3x4xf32> to vector<1x1x4xf32>
    %19 = vector.extract_strided_slice %11 {offsets = [2, 1, 0], sizes = [1, 1, 4], strides = [1, 1, 1]} : vector<3x3x4xf32> to vector<1x1x4xf32>
    %20 = vector.extract_strided_slice %11 {offsets = [2, 2, 0], sizes = [1, 1, 4], strides = [1, 1, 1]} : vector<3x3x4xf32> to vector<1x1x4xf32>
    %c0_21 = arith.constant 0 : index
    %c0_22 = arith.constant 0 : index
    %c0_23 = arith.constant 0 : index
    %21 = vector.load %arg4[%c0_21, %c0_22, %c0_23] : memref<1x1x4xf32, #tpu.memory_space<vmem>>, vector<1x1x4xf32>
    %22 = vector.shape_cast %21 : vector<1x1x4xf32> to vector<1x1x4xf32>
    %23 = vector.broadcast %22 : vector<1x1x4xf32> to vector<1x16x4xf32>
    %c0_24 = arith.constant 0 : index
    %c0_25 = arith.constant 0 : index
    %c0_26 = arith.constant 0 : index
    %24 = vector.load %arg6[%c0_24, %c0_25, %c0_26] : memref<16x16x4xf32, #tpu.memory_space<vmem>>, vector<1x16x4xf32>
    %25 = vector.broadcast %15 : vector<1x1x4xf32> to vector<1x16x4xf32>
    %26 = arith.mulf %25, %24 : vector<1x16x4xf32>
    %27 = arith.addf %23, %26 : vector<1x16x4xf32>
    %c0_27 = arith.constant 0 : index
    %c0_28 = arith.constant 0 : index
    %c0_29 = arith.constant 0 : index
    %c0_30 = arith.constant 0 : index
    %28 = vector.load %arg2[%c0_27, %c0_28, %c0_29, %c0_30] : memref<1x16x16x4xf32, #tpu.memory_space<vmem>>, vector<1x1x16x4xf32>
    %29 = vector.shape_cast %28 : vector<1x1x16x4xf32> to vector<1x16x4xf32>
    %30 = vector.broadcast %16 : vector<1x1x4xf32> to vector<1x16x4xf32>
    %31 = arith.mulf %30, %29 : vector<1x16x4xf32>
    %32 = arith.addf %27, %31 : vector<1x16x4xf32>
    %c0_31 = arith.constant 0 : index
    %c0_32 = arith.constant 0 : index
    %c0_33 = arith.constant 0 : index
    %33 = vector.load %arg7[%c0_31, %c0_32, %c0_33] : memref<16x16x4xf32, #tpu.memory_space<vmem>>, vector<1x16x4xf32>
    %34 = vector.broadcast %17 : vector<1x1x4xf32> to vector<1x16x4xf32>
    %35 = arith.mulf %34, %33 : vector<1x16x4xf32>
    %36 = arith.addf %32, %35 : vector<1x16x4xf32>
    %c1 = arith.constant 1 : index
    %c0_34 = arith.constant 0 : index
    %c0_35 = arith.constant 0 : index
    %37 = vector.load %arg6[%c1, %c0_34, %c0_35] : memref<16x16x4xf32, #tpu.memory_space<vmem>>, vector<1x16x4xf32>
    %38 = vector.broadcast %18 : vector<1x1x4xf32> to vector<1x16x4xf32>
    %39 = arith.mulf %38, %37 : vector<1x16x4xf32>
    %40 = arith.addf %36, %39 : vector<1x16x4xf32>
    %c0_36 = arith.constant 0 : index
    %c1_37 = arith.constant 1 : index
    %c0_38 = arith.constant 0 : index
    %c0_39 = arith.constant 0 : index
    %41 = vector.load %arg2[%c0_36, %c1_37, %c0_38, %c0_39] : memref<1x16x16x4xf32, #tpu.memory_space<vmem>>, vector<1x1x16x4xf32>
    %42 = vector.shape_cast %41 : vector<1x1x16x4xf32> to vector<1x16x4xf32>
    %43 = vector.broadcast %19 : vector<1x1x4xf32> to vector<1x16x4xf32>
    %44 = arith.mulf %43, %42 : vector<1x16x4xf32>
    %45 = arith.addf %40, %44 : vector<1x16x4xf32>
    %c1_40 = arith.constant 1 : index
    %c0_41 = arith.constant 0 : index
    %c0_42 = arith.constant 0 : index
    %46 = vector.load %arg7[%c1_40, %c0_41, %c0_42] : memref<16x16x4xf32, #tpu.memory_space<vmem>>, vector<1x16x4xf32>
    %47 = vector.broadcast %20 : vector<1x1x4xf32> to vector<1x16x4xf32>
    %48 = arith.mulf %47, %46 : vector<1x16x4xf32>
    %49 = arith.addf %45, %48 : vector<1x16x4xf32>
    %c0_43 = arith.constant 0 : index
    %c0_44 = arith.constant 0 : index
    %c0_45 = arith.constant 0 : index
    %c0_46 = arith.constant 0 : index
    %50 = vector.load %arg5[%c0_43, %c0_44, %c0_45, %c0_46] : memref<1x16x16x4xf32, #tpu.memory_space<vmem>>, vector<1x1x16x4xf32>
    %51 = vector.shape_cast %50 : vector<1x1x16x4xf32> to vector<1x16x4xf32>
    %52 = vector.shape_cast %49 : vector<1x16x4xf32> to vector<1x1x16x4xf32>
    tpu.vector_store %arg5[%c0_43, %c0_44, %c0_45, %c0_46], %52 {strides = array<i32>} : memref<1x16x16x4xf32, #tpu.memory_space<vmem>>, vector<1x1x16x4xf32>,
    %53 = vector.shape_cast %21 : vector<1x1x4xf32> to vector<1x1x4xf32>
    %54 = vector.broadcast %53 : vector<1x1x4xf32> to vector<14x16x4xf32>
    %c0_47 = arith.constant 0 : index
    %c0_48 = arith.constant 0 : index
    %c0_49 = arith.constant 0 : index
    %55 = vector.load %arg6[%c0_47, %c0_48, %c0_49] : memref<16x16x4xf32, #tpu.memory_space<vmem>>, vector<14x16x4xf32>
    %56 = vector.broadcast %12 : vector<1x1x4xf32> to vector<14x16x4xf32>
    %57 = arith.mulf %56, %55 : vector<14x16x4xf32>
    %58 = arith.addf %54, %57 : vector<14x16x4xf32>
    %c0_50 = arith.constant 0 : index
    %c0_51 = arith.constant 0 : index
    %c0_52 = arith.constant 0 : index
    %c0_53 = arith.constant 0 : index
    %59 = vector.load %arg2[%c0_50, %c0_51, %c0_52, %c0_53] : memref<1x16x16x4xf32, #tpu.memory_space<vmem>>, vector<1x14x16x4xf32>
    %60 = vector.shape_cast %59 : vector<1x14x16x4xf32> to vector<14x16x4xf32>
    %61 = vector.broadcast %13 : vector<1x1x4xf32> to vector<14x16x4xf32>
    %62 = arith.mulf %61, %60 : vector<14x16x4xf32>
    %63 = arith.addf %58, %62 : vector<14x16x4xf32>
    %c0_54 = arith.constant 0 : index
    %c0_55 = arith.constant 0 : index
    %c0_56 = arith.constant 0 : index
    %64 = vector.load %arg7[%c0_54, %c0_55, %c0_56] : memref<16x16x4xf32, #tpu.memory_space<vmem>>, vector<14x16x4xf32>
    %65 = vector.broadcast %14 : vector<1x1x4xf32> to vector<14x16x4xf32>
    %66 = arith.mulf %65, %64 : vector<14x16x4xf32>
    %67 = arith.addf %63, %66 : vector<14x16x4xf32>
    %c1_57 = arith.constant 1 : index
    %c0_58 = arith.constant 0 : index
    %c0_59 = arith.constant 0 : index
    %68 = vector.load %arg6[%c1_57, %c0_58, %c0_59] : memref<16x16x4xf32, #tpu.memory_space<vmem>>, vector<14x16x4xf32>
    %69 = vector.broadcast %15 : vector<1x1x4xf32> to vector<14x16x4xf32>
    %70 = arith.mulf %69, %68 : vector<14x16x4xf32>
    %71 = arith.addf %67, %70 : vector<14x16x4xf32>
    %c0_60 = arith.constant 0 : index
    %c1_61 = arith.constant 1 : index
    %c0_62 = arith.constant 0 : index
    %c0_63 = arith.constant 0 : index
    %72 = vector.load %arg2[%c0_60, %c1_61, %c0_62, %c0_63] : memref<1x16x16x4xf32, #tpu.memory_space<vmem>>, vector<1x14x16x4xf32>
    %73 = vector.shape_cast %72 : vector<1x14x16x4xf32> to vector<14x16x4xf32>
    %74 = vector.broadcast %16 : vector<1x1x4xf32> to vector<14x16x4xf32>
    %75 = arith.mulf %74, %73 : vector<14x16x4xf32>
    %76 = arith.addf %71, %75 : vector<14x16x4xf32>
    %c1_64 = arith.constant 1 : index
    %c0_65 = arith.constant 0 : index
    %c0_66 = arith.constant 0 : index
    %77 = vector.load %arg7[%c1_64, %c0_65, %c0_66] : memref<16x16x4xf32, #tpu.memory_space<vmem>>, vector<14x16x4xf32>
    %78 = vector.broadcast %17 : vector<1x1x4xf32> to vector<14x16x4xf32>
    %79 = arith.mulf %78, %77 : vector<14x16x4xf32>
    %80 = arith.addf %76, %79 : vector<14x16x4xf32>
    %c2 = arith.constant 2 : index
    %c0_67 = arith.constant 0 : index
    %c0_68 = arith.constant 0 : index
    %81 = vector.load %arg6[%c2, %c0_67, %c0_68] : memref<16x16x4xf32, #tpu.memory_space<vmem>>, vector<14x16x4xf32>
    %82 = vector.broadcast %18 : vector<1x1x4xf32> to vector<14x16x4xf32>
    %83 = arith.mulf %82, %81 : vector<14x16x4xf32>
    %84 = arith.addf %80, %83 : vector<14x16x4xf32>
    %c0_69 = arith.constant 0 : index
    %c2_70 = arith.constant 2 : index
    %c0_71 = arith.constant 0 : index
    %c0_72 = arith.constant 0 : index
    %85 = vector.load %arg2[%c0_69, %c2_70, %c0_71, %c0_72] : memref<1x16x16x4xf32, #tpu.memory_space<vmem>>, vector<1x14x16x4xf32>
    %86 = vector.shape_cast %85 : vector<1x14x16x4xf32> to vector<14x16x4xf32>
    %87 = vector.broadcast %19 : vector<1x1x4xf32> to vector<14x16x4xf32>
    %88 = arith.mulf %87, %86 : vector<14x16x4xf32>
    %89 = arith.addf %84, %88 : vector<14x16x4xf32>
    %c2_73 = arith.constant 2 : index
    %c0_74 = arith.constant 0 : index
    %c0_75 = arith.constant 0 : index
    %90 = vector.load %arg7[%c2_73, %c0_74, %c0_75] : memref<16x16x4xf32, #tpu.memory_space<vmem>>, vector<14x16x4xf32>
    %91 = vector.broadcast %20 : vector<1x1x4xf32> to vector<14x16x4xf32>
    %92 = arith.mulf %91, %90 : vector<14x16x4xf32>
    %93 = arith.addf %89, %92 : vector<14x16x4xf32>
    %c0_76 = arith.constant 0 : index
    %c1_77 = arith.constant 1 : index
    %c0_78 = arith.constant 0 : index
    %c0_79 = arith.constant 0 : index
    %94 = vector.load %arg5[%c0_76, %c1_77, %c0_78, %c0_79] : memref<1x16x16x4xf32, #tpu.memory_space<vmem>>, vector<1x14x16x4xf32>
    %95 = vector.shape_cast %94 : vector<1x14x16x4xf32> to vector<14x16x4xf32>
    %96 = vector.shape_cast %93 : vector<14x16x4xf32> to vector<1x14x16x4xf32>
    tpu.vector_store %arg5[%c0_76, %c1_77, %c0_78, %c0_79], %96 {strides = array<i32>} : memref<1x16x16x4xf32, #tpu.memory_space<vmem>>, vector<1x14x16x4xf32>,
    %97 = vector.shape_cast %21 : vector<1x1x4xf32> to vector<1x1x4xf32>
    %98 = vector.broadcast %97 : vector<1x1x4xf32> to vector<1x16x4xf32>
    %c14 = arith.constant 14 : index
    %c0_80 = arith.constant 0 : index
    %c0_81 = arith.constant 0 : index
    %99 = vector.load %arg6[%c14, %c0_80, %c0_81] : memref<16x16x4xf32, #tpu.memory_space<vmem>>, vector<1x16x4xf32>
    %100 = vector.broadcast %12 : vector<1x1x4xf32> to vector<1x16x4xf32>
    %101 = arith.mulf %100, %99 : vector<1x16x4xf32>
    %102 = arith.addf %98, %101 : vector<1x16x4xf32>
    %c0_82 = arith.constant 0 : index
    %c14_83 = arith.constant 14 : index
    %c0_84 = arith.constant 0 : index
    %c0_85 = arith.constant 0 : index
    %103 = vector.load %arg2[%c0_82, %c14_83, %c0_84, %c0_85] : memref<1x16x16x4xf32, #tpu.memory_space<vmem>>, vector<1x1x16x4xf32>
    %104 = vector.shape_cast %103 : vector<1x1x16x4xf32> to vector<1x16x4xf32>
    %105 = vector.broadcast %13 : vector<1x1x4xf32> to vector<1x16x4xf32>
    %106 = arith.mulf %105, %104 : vector<1x16x4xf32>
    %107 = arith.addf %102, %106 : vector<1x16x4xf32>
    %c14_86 = arith.constant 14 : index
    %c0_87 = arith.constant 0 : index
    %c0_88 = arith.constant 0 : index
    %108 = vector.load %arg7[%c14_86, %c0_87, %c0_88] : memref<16x16x4xf32, #tpu.memory_space<vmem>>, vector<1x16x4xf32>
    %109 = vector.broadcast %14 : vector<1x1x4xf32> to vector<1x16x4xf32>
    %110 = arith.mulf %109, %108 : vector<1x16x4xf32>
    %111 = arith.addf %107, %110 : vector<1x16x4xf32>
    %c15_89 = arith.constant 15 : index
    %c0_90 = arith.constant 0 : index
    %c0_91 = arith.constant 0 : index
    %112 = vector.load %arg6[%c15_89, %c0_90, %c0_91] : memref<16x16x4xf32, #tpu.memory_space<vmem>>, vector<1x16x4xf32>
    %113 = vector.broadcast %15 : vector<1x1x4xf32> to vector<1x16x4xf32>
    %114 = arith.mulf %113, %112 : vector<1x16x4xf32>
    %115 = arith.addf %111, %114 : vector<1x16x4xf32>
    %c0_92 = arith.constant 0 : index
    %c15_93 = arith.constant 15 : index
    %c0_94 = arith.constant 0 : index
    %c0_95 = arith.constant 0 : index
    %116 = vector.load %arg2[%c0_92, %c15_93, %c0_94, %c0_95] : memref<1x16x16x4xf32, #tpu.memory_space<vmem>>, vector<1x1x16x4xf32>
    %117 = vector.shape_cast %116 : vector<1x1x16x4xf32> to vector<1x16x4xf32>
    %118 = vector.broadcast %16 : vector<1x1x4xf32> to vector<1x16x4xf32>
    %119 = arith.mulf %118, %117 : vector<1x16x4xf32>
    %120 = arith.addf %115, %119 : vector<1x16x4xf32>
    %c15_96 = arith.constant 15 : index
    %c0_97 = arith.constant 0 : index
    %c0_98 = arith.constant 0 : index
    %121 = vector.load %arg7[%c15_96, %c0_97, %c0_98] : memref<16x16x4xf32, #tpu.memory_space<vmem>>, vector<1x16x4xf32>
    %122 = vector.broadcast %17 : vector<1x1x4xf32> to vector<1x16x4xf32>
    %123 = arith.mulf %122, %121 : vector<1x16x4xf32>
    %124 = arith.addf %120, %123 : vector<1x16x4xf32>
    %c0_99 = arith.constant 0 : index
    %c15_100 = arith.constant 15 : index
    %c0_101 = arith.constant 0 : index
    %c0_102 = arith.constant 0 : index
    %125 = vector.load %arg5[%c0_99, %c15_100, %c0_101, %c0_102] : memref<1x16x16x4xf32, #tpu.memory_space<vmem>>, vector<1x1x16x4xf32>
    %126 = vector.shape_cast %125 : vector<1x1x16x4xf32> to vector<1x16x4xf32>
    %127 = vector.shape_cast %124 : vector<1x16x4xf32> to vector<1x1x16x4xf32>
    tpu.vector_store %arg5[%c0_99, %c15_100, %c0_101, %c0_102], %127 {strides = array<i32>} : memref<1x16x16x4xf32, #tpu.memory_space<vmem>>, vector<1x1x16x4xf32>,
    return
  }
  func.func @transform_0(%arg0: i32, %arg1: i32) -> (i32, i32, i32, i32) {
    %c0_i32 = arith.constant 0 : i32
    %c0_i32_0 = arith.constant 0 : i32
    %c0_i32_1 = arith.constant 0 : i32
    return %arg0, %c0_i32, %c0_i32_0, %arg1 : i32, i32, i32, i32
  }
  func.func @transform_1(%arg0: i32, %arg1: i32) -> (i32, i32, i32) {
    %c0_i32 = arith.constant 0 : i32
    %c0_i32_0 = arith.constant 0 : i32
    %c0_i32_1 = arith.constant 0 : i32
    return %c0_i32, %c0_i32_0, %arg1 : i32, i32, i32
  }
  func.func @transform_2(%arg0: i32, %arg1: i32) -> (i32, i32, i32) {
    %c0_i32 = arith.constant 0 : i32
    %c0_i32_0 = arith.constant 0 : i32
    %c0_i32_1 = arith.constant 0 : i32
    return %c0_i32, %c0_i32_0, %arg1 : i32, i32, i32
  }
  func.func @transform_3(%arg0: i32, %arg1: i32) -> (i32, i32, i32, i32) {
    %c0_i32 = arith.constant 0 : i32
    %c0_i32_0 = arith.constant 0 : i32
    %c0_i32_1 = arith.constant 0 : i32
    return %arg0, %c0_i32, %c0_i32_0, %arg1 : i32, i32, i32, i32
  }
}

</mosaic_0001>

<bundles_post_ra>
// kernel: tpu_custom_call.1
= control target key start
LH: loop header
LB: loop body
LE: loop exit
PB: predicated region body
PF: predicated region fallthrough
CT: control target
= control target key end

     0   :  { %s1737_s12 = smov 0   ;;  %s1739_s13 = smov 0   ;;  %s2791_s0 = inlined_call_operand.vmem [shape: f32[2,16,16,4], index: 0, kind: input, shape index: {}]   ;;  %s2792_s1 = inlined_call_operand.vmem [shape: f32[3,3,4], index: 1, kind: input, shape index: {}]   ;;  %s2793_s2 = inlined_call_operand.vmem [shape: f32[1,1,4], index: 2, kind: input, shape index: {}]   ;;  %s2794_s3 = inlined_call_operand.vmem [shape: f32[2,16,16,4], index: 3, kind: output, shape index: {}]  }
   0x1   :  { %s1741_s14 = smov 0  }
   0x2 LB: > { %s25_s15 = sadd.s32 1, %s1710_s13  ;;  %p1564_p0 = scmp.ge.s32.totalorder %s1714_s14, 1  ;;  %s1714_s14 = sphi %s1741_s14, %s13_s14   ;;  %s1710_s13 = sphi %s1739_s13, %s2808_s13   ;;  %s1706_s12 = sphi %s1737_s12, %s2807_s12  }
   0x3   : > { %p27_p1 = scmp.ge.s32.totalorder %s25_s15, 2  ;;  %p173_p2 = scmp.lt.s32.totalorder %s1714_s14, 3 }
   0x5   : > { %s2810_s15 = smov (%p27_p1, %s25_s15), 0  ;;  %p174_p3 = pnand %p1564_p0, %p173_p2 }
   0x6   : > { %p210_p4 = scmp.lt.s32.totalorder (!%p174_p3), %s1706_s12, 1  ;;  %v297_v0 = vlaneseq (!%p174_p3)  ;;  %v528_v2 = vld [vmem:[%s2792_s1 + $0x4] sm:$0x7] (!%p174_p3)  ;;  %v529_v3 = vld [vmem:[%s2792_s1 + $0x8] sm:$0x7] (!%p174_p3)  ;;  %vm332_vm0 = vcmask (!%p174_p3), 31744  }
   0x7   : > { %177 = sbr.rel (%p174_p3) target bundleno = 212 (0xd4), region = 32  ;;  %v1783_v7 = vld [vmem:[%s2792_s1] sm:$0x7] (!%p174_p3)  ;;  %vm494_vm1 = vcmask (!%p174_p3), 24576   ;;  %v1716_v47 = vmov (!%p174_p3), 0.0  }
   0x8   : > { %v1757_v1 = vshrl.u32 (!%p174_p3), %v297_v0, 7 }
   0xa   : > { %v541_v4 = vsub.s32 (!%p174_p3), 0, %v1757_v1  ;;  %v1768_v5 = vsub.s32 (!%p174_p3), 1, %v1757_v1  ;;  %v1771_v6 = vsub.s32 (!%p174_p3), 2, %v1757_v1  ;;  %vm299_vm2 = vcmp.lt.s32.totalorder (!%p174_p3), %v1757_v1, 1 }
   0xb   : > { %vm429_vm3 = vcmp.lt.s32.totalorder (!%p174_p3), %v1757_v1, 7 }
   0xc   : > { %v1792_v10 = vrot.slane (!%p174_p3), %v528_v2, %v541_v4  ;;  %v1795_v11 = vrot.slane (!%p174_p3), %v528_v2, %v1768_v5  ;;  %v1803_v15 = vrot.slane (!%p174_p3), %v528_v2, %v1771_v6  ;;  %v1805_v16 = vrot.slane (!%p174_p3), %v529_v3, %v541_v4 }
   0xd   : > { %v1817_v20 = vrot.slane (!%p174_p3), %v529_v3, %v1768_v5  ;;  %v1820_v21 = vrot.slane (!%p174_p3), %v529_v3, %v1771_v6  ;;  %v1823_v22 = vrot.slane (!%p174_p3), %v1783_v7, %v541_v4 }
   0xe   : > { %s2812_s12 = smov (!%p210_p4, %s1706_s12), 1 }
   0xf   : > { %s1664_s18 = sshll.u32 %s2812_s12, 8 }
  0x10   : > { %s1778_s23 = scalar_lea.vmem %s2791_s0, %s1664_s18  ;;  %s2356_s30 = scalar_lea.vmem %s2794_s3, %s1664_s18 }
  0x11   : > { %v1786_v8 = vld [vmem:[%s1778_s23] sm:$0xff]  ;;  %v1789_v9 = vld [vmem:[%s1778_s23 + $0x8] sm:$0xff]  ;;  %v1798_v12 = vld [vmem:[%s1778_s23 + $0x10] sm:$0xff] }
  0x12   : > { %v265_v13 = vrot.slane %v1786_v8, 7  ;;  %v281_v14 = vrot.slane %v1789_v9, 7  ;;  %v1808_v17 = vld [vmem:[%s1778_s23 + $0x18] sm:$0xff]  ;;  %v1811_v18 = vld [vmem:[%s1778_s23 + $0x20] sm:$0xff]  ;;  %v1814_v19 = vld [vmem:[%s1778_s23 + $0x28] sm:$0xff]  ;;  %v266_v23 = vrot.slane %v1798_v12, 7 }
  0x13   : > { %v1827_v24 = vld [vmem:[%s1778_s23 + $0x30] sm:$0xff]  ;;  %v1830_v25 = vld [vmem:[%s1778_s23 + $0x38] sm:$0xff]  ;;  %v1833_v26 = vld [vmem:[%s1778_s23 + $0x40] sm:$0xff]  ;;  %v282_v29 = vrot.slane %v1808_v17, 7  ;;  %v267_v30 = vrot.slane %v1811_v18, 7  ;;  %v283_v34 = vrot.slane %v1814_v19, 7 }
  0x14   : > { %v316_v27 = vsel %vm299_vm2, %v281_v14, %v265_v13  ;;  %v300_v28 = vsel %vm299_vm2, %v265_v13, %v281_v14  ;;  %v1842_v31 = vld [vmem:[%s1778_s23 + $0x48] sm:$0xff]  ;;  %v1845_v32 = vld [vmem:[%s1778_s23 + $0x50] sm:$0xff]  ;;  %v1848_v33 = vld [vmem:[%s1778_s23 + $0x58] sm:$0xff]  ;;  %v268_v35 = vrot.slane %v1827_v24, 7  ;;  %v284_v36 = vrot.slane %v1830_v25, 7 }
  0x15   : > { %333 = vst.msk [vmem:[#allocation2] sm:$0xff] %vm332_vm0, %v316_v27  ;;  %334 = vst.msk [vmem:[#allocation2 + $0x8] sm:$0xff] %vm332_vm0, %v300_v28  ;;  %v269_v37 = vrot.slane %v1833_v26, 7  ;;  %v1857_v38 = vld [vmem:[%s1778_s23 + $0x60] sm:$0xff]  ;;  %v1860_v39 = vld [vmem:[%s1778_s23 + $0x68] sm:$0xff]  ;;  %v317_v40 = vsel %vm299_vm2, %v282_v29, %v266_v23  ;;  %v301_v41 = vsel %vm299_vm2, %v266_v23, %v282_v29  ;;  %v285_v42 = vrot.slane %v1842_v31, 7 }
  0x16   : > { %v270_v43 = vrot.slane %v1845_v32, 7  ;;  %v1869_v44 = vld [vmem:[%s1778_s23 + $0x70] sm:$0xff]  ;;  %v1872_v45 = vld [vmem:[%s1778_s23 + $0x78] sm:$0xff]  ;;  %v1875_v46 = vld [vmem:[%s1778_s23 + $0x80] sm:$0xff]  ;;  %495 = vst.msk [vmem:[#allocation2] sm:$0x1] %vm494_vm1, %v1716_v47  ;;  %v318_v48 = vsel %vm299_vm2, %v283_v34, %v267_v30  ;;  %v302_v49 = vsel %vm299_vm2, %v267_v30, %v283_v34  ;;  %v319_v50 = vsel %vm299_vm2, %v284_v36, %v268_v35 }
  0x17   : > { %335 = vst.msk [vmem:[#allocation2 + $0x10] sm:$0xff] %vm332_vm0, %v317_v40  ;;  %336 = vst.msk [vmem:[#allocation2 + $0x18] sm:$0xff] %vm332_vm0, %v301_v41  ;;  %v303_v51 = vsel %vm299_vm2, %v268_v35, %v284_v36  ;;  %v1890_v52 = vld [vmem:[%s1778_s23 + $0x88] sm:$0xff]  ;;  %v1893_v53 = vld [vmem:[%s1778_s23 + $0x90] sm:$0xff]  ;;  %v320_v54 = vsel %vm299_vm2, %v285_v42, %v269_v37  ;;  %v304_v55 = vsel %vm299_vm2, %v269_v37, %v285_v42  ;;  %v286_v56 = vrot.slane %v1848_v33, 7 }
  0x18   : > { %337 = vst.msk [vmem:[#allocation2 + $0x20] sm:$0xff] %vm332_vm0, %v318_v48  ;;  %338 = vst.msk [vmem:[#allocation2 + $0x28] sm:$0xff] %vm332_vm0, %v302_v49  ;;  %v271_v57 = vrot.slane %v1857_v38, 7  ;;  %v1906_v58 = vld [vmem:[%s1778_s23 + $0x98] sm:$0xff]  ;;  %v287_v59 = vrot.slane %v1860_v39, 7  ;;  %v272_v60 = vrot.slane %v1869_v44, 7 }
  0x19   : > { %339 = vst.msk [vmem:[#allocation2 + $0x30] sm:$0xff] %vm332_vm0, %v319_v50  ;;  %340 = vst.msk [vmem:[#allocation2 + $0x38] sm:$0xff] %vm332_vm0, %v303_v51  ;;  %v288_v61 = vrot.slane %v1872_v45, 7  ;;  %v273_v62 = vrot.slane %v1875_v46, 7  ;;  %v1918_v63 = vld [vmem:[%s1778_s23 + $0xa0] sm:$0xff]  ;;  %v1921_v0 = vld [vmem:[%s1778_s23 + $0xa8] sm:$0xff]  ;;  %v321_v2 = vsel %vm299_vm2, %v286_v56, %v270_v43  ;;  %v305_v3 = vsel %vm299_vm2, %v270_v43, %v286_v56 }
  0x1a   : > { %496 = vst.msk [vmem:[#allocation2 + $0x10] sm:$0x1] %vm494_vm1, %v1716_v47  ;;  %497 = vst.msk [vmem:[#allocation2 + $0x20] sm:$0x1] %vm494_vm1, %v1716_v47  ;;  %v289_v4 = vrot.slane %v1890_v52, 7  ;;  %v274_v13 = vrot.slane %v1893_v53, 7  ;;  %v322_v28 = vsel %vm299_vm2, %v287_v59, %v271_v57  ;;  %v306_v29 = vsel %vm299_vm2, %v271_v57, %v287_v59 }
  0x1b   : > { %341 = vst.msk [vmem:[#allocation2 + $0x40] sm:$0xff] %vm332_vm0, %v320_v54  ;;  %342 = vst.msk [vmem:[#allocation2 + $0x48] sm:$0xff] %vm332_vm0, %v304_v55  ;;  %v1934_v14 = vld [vmem:[%s1778_s23 + $0xb0] sm:$0xff]  ;;  %v1937_v23 = vld [vmem:[%s1778_s23 + $0xb8] sm:$0xff]  ;;  %v323_v30 = vsel %vm299_vm2, %v288_v61, %v272_v60  ;;  %v307_v34 = vsel %vm299_vm2, %v272_v60, %v288_v61  ;;  %v290_v41 = vrot.slane %v1906_v58, 7  ;;  %v275_v42 = vrot.slane %v1918_v63, 7 }
  0x1c   : > { %498 = vst.msk [vmem:[#allocation2 + $0x30] sm:$0x1] %vm494_vm1, %v1716_v47  ;;  %v1940_v27 = vld [vmem:[%s1778_s23 + $0xc0] sm:$0xff]  ;;  %499 = vst.msk [vmem:[#allocation2 + $0x40] sm:$0x1] %vm494_vm1, %v1716_v47  ;;  %v1955_v35 = vld [vmem:[%s1778_s23 + $0xc8] sm:$0xff]  ;;  %v324_v37 = vsel %vm299_vm2, %v289_v4, %v273_v62  ;;  %v308_v40 = vsel %vm299_vm2, %v273_v62, %v289_v4 }
  0x1d   : > { %343 = vst.msk [vmem:[#allocation2 + $0x50] sm:$0xff] %vm332_vm0, %v321_v2  ;;  %344 = vst.msk [vmem:[#allocation2 + $0x58] sm:$0xff] %vm332_vm0, %v305_v3  ;;  %v1958_v36 = vld [vmem:[%s1778_s23 + $0xd0] sm:$0xff]  ;;  %v291_v43 = vrot.slane %v1921_v0, 7  ;;  %v276_v48 = vrot.slane %v1934_v14, 7  ;;  %v292_v49 = vrot.slane %v1937_v23, 7  ;;  %v325_v54 = vsel %vm299_vm2, %v290_v41, %v274_v13 }
  0x1e   : > { %345 = vst.msk [vmem:[#allocation2 + $0x60] sm:$0xff] %vm332_vm0, %v322_v28  ;;  %346 = vst.msk [vmem:[#allocation2 + $0x68] sm:$0xff] %vm332_vm0, %v306_v29  ;;  %v277_v50 = vrot.slane %v1940_v27, 7  ;;  %v1979_v51 = vld [vmem:[%s1778_s23 + $0xd8] sm:$0xff]  ;;  %v309_v55 = vsel %vm299_vm2, %v274_v13, %v290_v41  ;;  %v293_v56 = vrot.slane %v1955_v35, 7  ;;  %v278_v57 = vrot.slane %v1958_v36, 7 }
  0x1f   : > { %347 = vst.msk [vmem:[#allocation2 + $0x70] sm:$0xff] %vm332_vm0, %v323_v30  ;;  %348 = vst.msk [vmem:[#allocation2 + $0x78] sm:$0xff] %vm332_vm0, %v307_v34  ;;  %v326_v59 = vsel %vm299_vm2, %v291_v43, %v275_v42  ;;  %v310_v60 = vsel %vm299_vm2, %v275_v42, %v291_v43  ;;  %v327_v61 = vsel %vm299_vm2, %v292_v49, %v276_v48  ;;  %v294_v4 = vrot.slane %v1979_v51, 7 }
  0x20   : > { %500 = vst.msk [vmem:[#allocation2 + $0x50] sm:$0x1] %vm494_vm1, %v1716_v47  ;;  %501 = vst.msk [vmem:[#allocation2 + $0x60] sm:$0x1] %vm494_vm1, %v1716_v47  ;;  %v311_v62 = vsel %vm299_vm2, %v276_v48, %v292_v49  ;;  %v328_v2 = vsel %vm299_vm2, %v293_v56, %v277_v50  ;;  %v312_v3 = vsel %vm299_vm2, %v277_v50, %v293_v56  ;;  %v397_v13 = vrot.slane %v1786_v8, 1 }
  0x21   : > { %349 = vst.msk [vmem:[#allocation2 + $0x80] sm:$0xff] %vm332_vm0, %v324_v37  ;;  %350 = vst.msk [vmem:[#allocation2 + $0x88] sm:$0xff] %vm332_vm0, %v308_v40  ;;  %v413_v28 = vrot.slane %v1789_v9, 1  ;;  %v398_v29 = vrot.slane %v1798_v12, 1  ;;  %v414_v30 = vrot.slane %v1808_v17, 1  ;;  %v399_v34 = vrot.slane %v1811_v18, 1 }
  0x22   : > { %502 = vst.msk [vmem:[#allocation2 + $0x70] sm:$0x1] %vm494_vm1, %v1716_v47  ;;  %503 = vst.msk [vmem:[#allocation2 + $0x80] sm:$0x1] %vm494_vm1, %v1716_v47  ;;  %v329_v37 = vsel %vm299_vm2, %v294_v4, %v278_v57  ;;  %v313_v40 = vsel %vm299_vm2, %v278_v57, %v294_v4  ;;  %v415_v41 = vrot.slane %v1814_v19, 1  ;;  %v400_v42 = vrot.slane %v1827_v24, 1 }
  0x23   : > { %351 = vst.msk [vmem:[#allocation2 + $0x90] sm:$0xff] %vm332_vm0, %v325_v54  ;;  %352 = vst.msk [vmem:[#allocation2 + $0x98] sm:$0xff] %vm332_vm0, %v309_v55  ;;  %v446_v43 = vsel %vm429_vm3, %v413_v28, %v397_v13  ;;  %v447_v48 = vsel %vm429_vm3, %v414_v30, %v398_v29  ;;  %v416_v49 = vrot.slane %v1830_v25, 1  ;;  %v401_v50 = vrot.slane %v1833_v26, 1 }
  0x24   : > { %353 = vst.msk [vmem:[#allocation2 + $0xa0] sm:$0xff] %vm332_vm0, %v326_v59  ;;  %354 = vst.msk [vmem:[#allocation2 + $0xa8] sm:$0xff] %vm332_vm0, %v310_v60  ;;  %v448_v54 = vsel %vm429_vm3, %v415_v41, %v399_v34  ;;  %v417_v55 = vrot.slane %v1842_v31, 1  ;;  %v2800_v56 = vrot.slane %v1845_v32, 1  ;;  %v418_v57 = vrot.slane %v1848_v33, 1 }
  0x25   : > { %355 = vst.msk [vmem:[#allocation2 + $0xb0] sm:$0xff] %vm332_vm0, %v327_v61  ;;  %356 = vst.msk [vmem:[#allocation2 + $0xb8] sm:$0xff] %vm332_vm0, %v311_v62  ;;  %v449_v59 = vsel %vm429_vm3, %v416_v49, %v400_v42  ;;  %v2795_v60 = vrot.slane %v1857_v38, 1  ;;  %v2796_v61 = vrot.slane %v1860_v39, 1  ;;  %v2797_v62 = vrot.slane %v1869_v44, 1 }
  0x26   : > { %504 = vst.msk [vmem:[#allocation2 + $0x90] sm:$0x1] %vm494_vm1, %v1716_v47  ;;  %505 = vst.msk [vmem:[#allocation2 + $0xa0] sm:$0x1] %vm494_vm1, %v1716_v47  ;;  %v2798_v4 = vrot.slane %v1872_v45, 1  ;;  %v433_v18 = vsel %vm429_vm3, %v400_v42, %v416_v49  ;;  %v2802_v24 = vrot.slane %v1860_v39, 1 }
  0x27   : > { %357 = vst.msk [vmem:[#allocation2 + $0xc0] sm:$0xff] %vm332_vm0, %v328_v2  ;;  %358 = vst.msk [vmem:[#allocation2 + $0xc8] sm:$0xff] %vm332_vm0, %v312_v3  ;;  %v450_v2 = vsel %vm429_vm3, %v417_v55, %v401_v50  ;;  %v451_v3 = vsel %vm429_vm3, %v418_v57, %v2800_v56  ;;  %v426_v56 = vrot.slane %v1979_v51, 1  ;;  %v2803_v26 = vrot.slane %v1857_v38, 1  ;;  %v538_v38 = vld [vmem:[#allocation2 + $0x8] sm:$0xff] }
  0x28   : > { %506 = vst.msk [vmem:[#allocation2 + $0xb0] sm:$0x1] %vm494_vm1, %v1716_v47  ;;  %507 = vst.msk [vmem:[#allocation2 + $0xc0] sm:$0x1] %vm494_vm1, %v1716_v47  ;;  %v2804_v42 = vrot.slane %v1872_v45, 1  ;;  %v2805_v49 = vrot.slane %v1869_v44, 1 }
  0x29   : > { %359 = vst.msk [vmem:[#allocation2 + $0xd0] sm:$0xff] %vm332_vm0, %v329_v37  ;;  %360 = vst.msk [vmem:[#allocation2 + $0xd8] sm:$0xff] %vm332_vm0, %v313_v40  ;;  %v2799_v37 = vrot.slane %v1875_v46, 1  ;;  %v452_v40 = vsel %vm429_vm3, %v2796_v61, %v2795_v60  ;;  %v2121_v60 = vld [vmem:[%s1778_s23 + $0xe0] sm:$0xff]  ;;  %v2124_v61 = vld [vmem:[%s1778_s23 + $0xe8] sm:$0xff] }
  0x2a   : > { %508 = vst.msk [vmem:[#allocation2 + $0xd0] sm:$0x1] %vm494_vm1, %v1716_v47 }
  0x2b   : > { %463 = vst.msk [vmem:[#allocation3 + $0x8] sm:$0xff] %vm332_vm0, %v446_v43  ;;  %465 = vst.msk [vmem:[#allocation3 + $0x18] sm:$0xff] %vm332_vm0, %v447_v48  ;;  %v421_v43 = vrot.slane %v1890_v52, 1  ;;  %v406_v48 = vrot.slane %v1893_v53, 1  ;;  %v423_v53 = vrot.slane %v1921_v0, 1 }
  0x2c   : > { %511 = vst.msk [vmem:[#allocation3 + $0xf] sm:$0x1] %vm494_vm1, %v1716_v47  ;;  %512 = vst.msk [vmem:[#allocation3 + $0x1f] sm:$0x1] %vm494_vm1, %v1716_v47 }
  0x2d   : > { %467 = vst.msk [vmem:[#allocation3 + $0x28] sm:$0xff] %vm332_vm0, %v448_v54  ;;  %469 = vst.msk [vmem:[#allocation3 + $0x38] sm:$0xff] %vm332_vm0, %v449_v59  ;;  %v422_v54 = vrot.slane %v1906_v58, 1  ;;  %v453_v59 = vsel %vm429_vm3, %v2798_v4, %v2797_v62  ;;  %v424_v62 = vrot.slane %v1937_v23, 1  ;;  %v425_v4 = vrot.slane %v1955_v35, 1 }
  0x2e   : > { %513 = vst.msk [vmem:[#allocation3 + $0x2f] sm:$0x1] %vm494_vm1, %v1716_v47  ;;  %514 = vst.msk [vmem:[#allocation3 + $0x3f] sm:$0x1] %vm494_vm1, %v1716_v47  ;;  %v430_v35 = vsel %vm429_vm3, %v397_v13, %v413_v28  ;;  %v431_v13 = vsel %vm429_vm3, %v398_v29, %v414_v30  ;;  %v432_v28 = vsel %vm429_vm3, %v399_v34, %v415_v41  ;;  %v2801_v30 = vrot.slane %v1845_v32, 1  ;;  %v2208_v41 = vld [vmem:[%s1778_s23 + $0xf0] sm:$0xff] }
  0x2f   : > { %471 = vst.msk [vmem:[#allocation3 + $0x48] sm:$0xff] %vm332_vm0, %v450_v2  ;;  %473 = vst.msk [vmem:[#allocation3 + $0x58] sm:$0xff] %vm332_vm0, %v451_v3  ;;  %v407_v2 = vrot.slane %v1918_v63, 1  ;;  %v408_v3 = vrot.slane %v1934_v14, 1  ;;  %v455_v63 = vsel %vm429_vm3, %v422_v54, %v406_v48  ;;  %v409_v14 = vrot.slane %v1940_v27, 1 }
  0x30   : > { %515 = vst.msk [vmem:[#allocation3 + $0x4f] sm:$0x1] %vm494_vm1, %v1716_v47  ;;  %516 = vst.msk [vmem:[#allocation3 + $0x5f] sm:$0x1] %vm494_vm1, %v1716_v47  ;;  %v279_v27 = vrot.slane %v2121_v60, 7  ;;  %v434_v29 = vsel %vm429_vm3, %v401_v50, %v417_v55  ;;  %v435_v34 = vsel %vm429_vm3, %v2801_v30, %v418_v57  ;;  %v436_v32 = vsel %vm429_vm3, %v2803_v26, %v2802_v24 }
  0x31   : > { %475 = vst.msk [vmem:[#allocation3 + $0x68] sm:$0xff] %vm332_vm0, %v452_v40  ;;  %477 = vst.msk [vmem:[#allocation3 + $0x78] sm:$0xff] %vm332_vm0, %v453_v59  ;;  %v454_v40 = vsel %vm429_vm3, %v421_v43, %v2799_v37  ;;  %v456_v59 = vsel %vm429_vm3, %v423_v53, %v407_v2  ;;  %v410_v37 = vrot.slane %v1958_v36, 1  ;;  %v457_v23 = vsel %vm429_vm3, %v424_v62, %v408_v3 }
  0x32   : > { %517 = vst.msk [vmem:[#allocation3 + $0x6f] sm:$0x1] %vm494_vm1, %v1716_v47  ;;  %518 = vst.msk [vmem:[#allocation3 + $0x7f] sm:$0x1] %vm494_vm1, %v1716_v47  ;;  %v458_v36 = vsel %vm429_vm3, %v425_v4, %v409_v14  ;;  %v437_v50 = vsel %vm429_vm3, %v2805_v49, %v2804_v42  ;;  %v2806_v55 = vrot.slane %v1875_v46, 1  ;;  %v440_v44 = vsel %vm429_vm3, %v407_v2, %v423_v53 }
  0x33   : > { %479 = vst.msk [vmem:[#allocation3 + $0x88] sm:$0xff] %vm332_vm0, %v454_v40  ;;  %481 = vst.msk [vmem:[#allocation3 + $0x98] sm:$0xff] %vm332_vm0, %v455_v63  ;;  %v295_v40 = vrot.slane %v2124_v61, 7  ;;  %v459_v51 = vsel %vm429_vm3, %v426_v56, %v410_v37  ;;  %v441_v46 = vsel %vm429_vm3, %v408_v3, %v424_v62  ;;  %v411_v2 = vrot.slane %v2121_v60, 1  ;;  %v2269_v3 = vld [vmem:[%s2793_s2] ss:$0 sm:$0xff] }
  0x34   : > { %519 = vst.msk [vmem:[#allocation3 + $0x8f] sm:$0x1] %vm494_vm1, %v1716_v47  ;;  %520 = vst.msk [vmem:[#allocation3 + $0x9f] sm:$0x1] %vm494_vm1, %v1716_v47  ;;  %v438_v57 = vsel %vm429_vm3, %v2806_v55, %v421_v43  ;;  %v442_v43 = vsel %vm429_vm3, %v409_v14, %v425_v4  ;;  %v427_v62 = vrot.slane %v2124_v61, 1  ;;  %v280_v4 = vrot.slane %v2208_v41, 7 }
  0x35   : > { %483 = vst.msk [vmem:[#allocation3 + $0xa8] sm:$0xff] %vm332_vm0, %v456_v59  ;;  %485 = vst.msk [vmem:[#allocation3 + $0xb8] sm:$0xff] %vm332_vm0, %v457_v23  ;;  %v330_v63 = vsel %vm299_vm2, %v295_v40, %v279_v27  ;;  %v439_v59 = vsel %vm429_vm3, %v406_v48, %v422_v54  ;;  %v2237_v23 = vld [vmem:[%s1778_s23 + $0xf8] sm:$0xff]  ;;  %v443_v48 = vsel %vm429_vm3, %v410_v37, %v426_v56  ;;  %v412_v37 = vrot.slane %v2208_v41, 1 }
  0x36   : > { %521 = vst.msk [vmem:[#allocation3 + $0xaf] sm:$0x1] %vm494_vm1, %v1716_v47  ;;  %522 = vst.msk [vmem:[#allocation3 + $0xbf] sm:$0x1] %vm494_vm1, %v1716_v47  ;;  %v314_v54 = vsel %vm299_vm2, %v279_v27, %v295_v40  ;;  %v296_v56 = vrot.slane %v2237_v23, 7  ;;  %v428_v53 = vrot.slane %v2237_v23, 1  ;;  %v544_v14 = vmul.f32 %v1792_v10, %v538_v38 }
  0x37   : > { %462 = vst.msk [vmem:[#allocation3] sm:$0xff] %vm332_vm0, %v430_v35  ;;  %487 = vst.msk [vmem:[#allocation3 + $0xc8] sm:$0xff] %vm332_vm0, %v458_v36  ;;  %v558_v27 = vld [vmem:[#allocation3 + $0x8] sm:$0xff]  ;;  %v2274_v40 = vrot.slane %v1783_v7, %v1768_v5  ;;  %v460_v35 = vsel %vm429_vm3, %v427_v62, %v411_v2  ;;  %v444_v36 = vsel %vm429_vm3, %v411_v2, %v427_v62  ;;  %v591_v30 = vld [vmem:[#allocation3 + $0x18] sm:$0xff] }
  0x38   : > { %489 = vst.msk [vmem:[#allocation3 + $0xd8] sm:$0xff] %vm332_vm0, %v459_v51  ;;  %464 = vst.msk [vmem:[#allocation3 + $0x10] sm:$0xff] %vm332_vm0, %v431_v13  ;;  %v554_v51 = vmul.f32 %v1795_v11, %v1789_v9  ;;  %v569_v13 = vld [vmem:[#allocation2 + $0x18] sm:$0xff]  ;;  %v331_v5 = vsel %vm299_vm2, %v296_v56, %v280_v4  ;;  %v2298_v24 = vrot.slane %v1783_v7, %v1771_v6 }
  0x39   : > { %466 = vst.msk [vmem:[#allocation3 + $0x20] sm:$0xff] %vm332_vm0, %v432_v28  ;;  %361 = vst.msk [vmem:[#allocation2 + $0xe0] sm:$0xff] %vm332_vm0, %v330_v63  ;;  %v2282_v28 = vld [vmem:[#allocation2] sm:$0xff]  ;;  %v315_v63 = vsel %vm299_vm2, %v280_v4, %v296_v56  ;;  %v546_v1 = vadd.f32 %v2269_v3, %v544_v14  ;;  %v564_v26 = vmul.f32 %v1803_v15, %v558_v27  ;;  %v1290_v4 = vld [vmem:[#allocation3 + $0x28] sm:$0xff] }
  0x3a   : > { %523 = vst.msk [vmem:[#allocation3 + $0xcf] sm:$0x1] %vm494_vm1, %v1716_v47  ;;  %524 = vst.msk [vmem:[#allocation3 + $0xdf] sm:$0x1] %vm494_vm1, %v1716_v47  ;;  %v575_v6 = vmul.f32 %v1805_v16, %v569_v13  ;;  %v586_v7 = vmul.f32 %v1817_v20, %v1808_v17  ;;  %v543_v42 = vmul.f32 %v1792_v10, %v2282_v28 }
  0x3b   : > { %468 = vst.msk [vmem:[#allocation3 + $0x30] sm:$0xff] %vm332_vm0, %v433_v18  ;;  %470 = vst.msk [vmem:[#allocation3 + $0x40] sm:$0xff] %vm332_vm0, %v434_v29  ;;  %v461_v18 = vsel %vm429_vm3, %v428_v53, %v412_v37  ;;  %v445_v29 = vsel %vm429_vm3, %v412_v37, %v428_v53  ;;  %v553_v49 = vmul.f32 %v1795_v11, %v1786_v8 }
  0x3c   : > { %472 = vst.msk [vmem:[#allocation3 + $0x50] sm:$0xff] %vm332_vm0, %v435_v34  ;;  %474 = vst.msk [vmem:[#allocation3 + $0x60] sm:$0xff] %vm332_vm0, %v436_v32  ;;  %v2308_v32 = vld [vmem:[#allocation2 + $0x10] sm:$0xff]  ;;  %v556_v55 = vadd.f32 %v554_v51, %v546_v1  ;;  %v723_v8 = vmul.f32 %v2274_v40, %v1789_v9  ;;  %v811_v62 = vmul.f32 %v2298_v24, %v558_v27 }
  0x3d   : > { %509 = vst.msk [vmem:[#allocation2 + $0xe0] sm:$0x1] %vm494_vm1, %v1716_v47  ;;  %v895_v37 = vmul.f32 %v569_v13, %v1792_v10  ;;  %v1063_v53 = vmul.f32 %v591_v30, %v1803_v15 }
  0x3e   : > { %476 = vst.msk [vmem:[#allocation3 + $0x70] sm:$0xff] %vm332_vm0, %v437_v50  ;;  %478 = vst.msk [vmem:[#allocation3 + $0x80] sm:$0xff] %vm332_vm0, %v438_v57  ;;  %v2294_v34 = vld [vmem:[#allocation3] sm:$0xff]  ;;  %v597_v57 = vmul.f32 %v1820_v21, %v591_v30 }
  0x3f   : > { %480 = vst.msk [vmem:[#allocation3 + $0x90] sm:$0xff] %vm332_vm0, %v439_v59  ;;  %482 = vst.msk [vmem:[#allocation3 + $0xa0] sm:$0xff] %vm332_vm0, %v440_v44  ;;  %v2321_v50 = vld [vmem:[#allocation3 + $0x10] sm:$0xff]  ;;  %v563_v59 = vmul.f32 %v1803_v15, %v2294_v34  ;;  %v545_v44 = vadd.f32 %v2269_v3, %v543_v42  ;;  %v981_v42 = vmul.f32 %v1795_v11, %v1814_v19 }
  0x40   : > { %484 = vst.msk [vmem:[#allocation3 + $0xb0] sm:$0xff] %vm332_vm0, %v441_v46  ;;  %486 = vst.msk [vmem:[#allocation3 + $0xc0] sm:$0xff] %vm332_vm0, %v442_v43  ;;  %v574_v46 = vmul.f32 %v1805_v16, %v2308_v32  ;;  %v585_v43 = vmul.f32 %v1817_v20, %v1798_v12  ;;  %v979_v12 = vmul.f32 %v1795_v11, %v1808_v17 }
  0x41   : > { %488 = vst.msk [vmem:[#allocation3 + $0xd0] sm:$0xff] %vm332_vm0, %v443_v48  ;;  %362 = vst.msk [vmem:[#allocation2 + $0xe8] sm:$0xff] %vm332_vm0, %v314_v54  ;;  %v566_v48 = vadd.f32 %v564_v26, %v556_v55  ;;  %v596_v54 = vmul.f32 %v1820_v21, %v2321_v50  ;;  %v555_v56 = vadd.f32 %v553_v49, %v545_v44 }
  0x42   : > { %491 = vst.msk [vmem:[#allocation3 + $0xe8] sm:$0xff] %vm332_vm0, %v460_v35  ;;  %490 = vst.msk [vmem:[#allocation3 + $0xe0] sm:$0xff] %vm332_vm0, %v444_v36  ;;  %v637_v35 = vmul.f32 %v1823_v22, %v569_v13  ;;  %v725_v36 = vmul.f32 %v2274_v40, %v1808_v17  ;;  %v813_v26 = vmul.f32 %v2298_v24, %v591_v30  ;;  %v1292_v30 = vld [vmem:[#allocation3 + $0x38] sm:$0xff] }
  0x43   : > { %525 = vst.msk [vmem:[#allocation3 + $0xef] sm:$0x1] %vm494_vm1, %v1716_v47  ;;  %v577_v9 = vadd.f32 %v575_v6, %v566_v48  ;;  %v565_v51 = vadd.f32 %v563_v59, %v555_v56  ;;  %v1122_v6 = vld [vmem:[#allocation2 + $0x38] sm:$0xff]  ;;  %v1235_v48 = vmul.f32 %v1817_v20, %v1830_v25  ;;  %v815_v56 = vmul.f32 %v1290_v4, %v2298_v24 }
  0x44   : > { %363 = vst.msk [vmem:[#allocation2 + $0xf0] sm:$0xff] %vm332_vm0, %v331_v5  ;;  %364 = vst.msk [vmem:[#allocation2 + $0xf8] sm:$0xff] %vm332_vm0, %v315_v63  ;;  %v1233_v5 = vmul.f32 %v1817_v20, %v1814_v19  ;;  %v1318_v63 = vmul.f32 %v1290_v4, %v1820_v21  ;;  %v665_v1 = vadd.f32 %v2269_v3, %v637_v35  ;;  %v1294_v35 = vld [vmem:[#allocation3 + $0x48] sm:$0xff] }
  0x45   : > { %493 = vst.msk [vmem:[#allocation3 + $0xf8] sm:$0xff] %vm332_vm0, %v461_v18  ;;  %492 = vst.msk [vmem:[#allocation3 + $0xf0] sm:$0xff] %vm332_vm0, %v445_v29  ;;  %v588_v18 = vadd.f32 %v586_v7, %v577_v9  ;;  %v576_v17 = vadd.f32 %v574_v46, %v565_v51  ;;  %v1065_v7 = vmul.f32 %v1290_v4, %v1803_v15 }
  0x46   : > { %510 = vst.msk [vmem:[#allocation2 + $0xf0] sm:$0x1] %vm494_vm1, %v1716_v47  ;;  %526 = vst.msk [vmem:[#allocation3 + $0xff] sm:$0x1] %vm494_vm1, %v1716_v47  ;;  %v635_v47 = vmul.f32 %v1823_v22, %v538_v38  ;;  %v1120_v38 = vld [vmem:[#allocation2 + $0x28] sm:$0xff]  ;;  %v753_v59 = vadd.f32 %v725_v36, %v665_v1  ;;  %v727_v46 = vmul.f32 %v2274_v40, %v1814_v19 }
  0x47   : > { %v1148_v27 = vmul.f32 %v1120_v38, %v1805_v16  ;;  %v897_v13 = vmul.f32 %v1120_v38, %v1792_v10  ;;  %v599_v49 = vadd.f32 %v597_v57, %v588_v18  ;;  %v587_v44 = vadd.f32 %v585_v43, %v576_v17 }
  0x48   : > { %v663_v2 = vadd.f32 %v2269_v3, %v635_v47  ;;  %v639_v47 = vmul.f32 %v1120_v38, %v1823_v22  ;;  %v1320_v43 = vmul.f32 %v1292_v30, %v1820_v21  ;;  %v899_v9 = vmul.f32 %v1122_v6, %v1792_v10 }
  0x49   : > { %601 = vst.msk [vmem:[%s2356_s30 + $0x8] sm:$0xff] %vm332_vm0, %v599_v49  ;;  %v598_v38 = vadd.f32 %v596_v54, %v587_v44  ;;  %v1237_v54 = vmul.f32 %v1817_v20, %v1842_v31  ;;  %v641_v4 = vmul.f32 %v1122_v6, %v1823_v22 }
  0x4a   : > { %v751_v14 = vadd.f32 %v723_v8, %v663_v2  ;;  %v1150_v8 = vmul.f32 %v1122_v6, %v1805_v16  ;;  %v667_v57 = vadd.f32 %v2269_v3, %v639_v47  ;;  %v985_v47 = vmul.f32 %v1795_v11, %v1842_v31 }
  0x4b   : > { %600 = vst.msk [vmem:[%s2356_s30] sm:$0xff] %vm332_vm0, %v598_v38  ;;  %v669_v49 = vadd.f32 %v2269_v3, %v641_v4 }
  0x4c   : > { %v839_v29 = vadd.f32 %v811_v62, %v751_v14  ;;  %v841_v62 = vadd.f32 %v813_v26, %v753_v59  ;;  %v983_v14 = vmul.f32 %v1795_v11, %v1830_v25  ;;  %v755_v51 = vadd.f32 %v727_v46, %v667_v57 }
  0x4e   : > { %v923_v55 = vadd.f32 %v895_v37, %v839_v29  ;;  %v1124_v37 = vld [vmem:[#allocation2 + $0x48] sm:$0xff]  ;;  %v925_v36 = vadd.f32 %v897_v13, %v841_v62  ;;  %v729_v29 = vmul.f32 %v2274_v40, %v1830_v25  ;;  %v843_v17 = vadd.f32 %v815_v56, %v755_v51  ;;  %v1126_v13 = vld [vmem:[#allocation2 + $0x58] sm:$0xff] }
  0x4f   : > { %v1152_v18 = vmul.f32 %v1124_v37, %v1805_v16  ;;  %v901_v59 = vmul.f32 %v1124_v37, %v1792_v10  ;;  %v1069_v25 = vmul.f32 %v1294_v35, %v1803_v15  ;;  %v643_v62 = vmul.f32 %v1124_v37, %v1823_v22  ;;  %v1128_v51 = vld [vmem:[#allocation2 + $0x68] sm:$0xff] }
  0x50   : > { %v1007_v2 = vadd.f32 %v979_v12, %v923_v55  ;;  %v1067_v12 = vmul.f32 %v1292_v30, %v1803_v15  ;;  %v1009_v26 = vadd.f32 %v981_v42, %v925_v36  ;;  %v817_v55 = vmul.f32 %v1292_v30, %v2298_v24 }
  0x51   : > { %v927_v46 = vadd.f32 %v899_v9, %v843_v17  ;;  %v757_v42 = vadd.f32 %v729_v29, %v669_v49  ;;  %v731_v30 = vmul.f32 %v2274_v40, %v1842_v31  ;;  %v819_v36 = vmul.f32 %v1294_v35, %v2298_v24 }
  0x52   : > { %v1091_v19 = vadd.f32 %v1063_v53, %v1007_v2  ;;  %v1322_v53 = vmul.f32 %v1294_v35, %v1820_v21  ;;  %v1093_v6 = vadd.f32 %v1065_v7, %v1009_v26  ;;  %v1154_v2 = vmul.f32 %v1126_v13, %v1805_v16 }
  0x53   : > { %v1011_v38 = vadd.f32 %v983_v14, %v927_v46  ;;  %v845_v7 = vadd.f32 %v817_v55, %v757_v42  ;;  %v903_v31 = vmul.f32 %v1126_v13, %v1792_v10  ;;  %v645_v26 = vmul.f32 %v1126_v13, %v1823_v22  ;;  %v1130_v13 = vld [vmem:[#allocation2 + $0x78] sm:$0xff] }
  0x54   : > { %v1176_v1 = vadd.f32 %v1148_v27, %v1091_v19  ;;  %v1296_v27 = vld [vmem:[#allocation3 + $0x58] sm:$0xff]  ;;  %v1178_v56 = vadd.f32 %v1150_v8, %v1093_v6  ;;  %v671_v19 = vadd.f32 %v2269_v3, %v643_v62  ;;  %v1156_v49 = vmul.f32 %v1128_v51, %v1805_v16 }
  0x55   : > { %v1324_v9 = vmul.f32 %v1296_v27, %v1820_v21  ;;  %v1095_v4 = vadd.f32 %v1067_v12, %v1011_v38  ;;  %v929_v8 = vadd.f32 %v901_v59, %v845_v7  ;;  %v1071_v29 = vmul.f32 %v1296_v27, %v1803_v15 }
  0x56   : > { %v1261_v44 = vadd.f32 %v1233_v5, %v1176_v1  ;;  %v1239_v5 = vmul.f32 %v1817_v20, %v1848_v33  ;;  %v1263_v37 = vadd.f32 %v1235_v48, %v1178_v56  ;;  %v759_v14 = vadd.f32 %v731_v30, %v671_v19  ;;  %v1298_v1 = vld [vmem:[#allocation3 + $0x68] sm:$0xff]  ;;  %v1300_v30 = vld [vmem:[#allocation3 + $0x78] sm:$0xff] }
  0x57   : > { %v1180_v35 = vadd.f32 %v1152_v18, %v1095_v4  ;;  %v733_v48 = vmul.f32 %v2274_v40, %v1848_v33  ;;  %v1013_v12 = vadd.f32 %v985_v47, %v929_v8  ;;  %v821_v6 = vmul.f32 %v1296_v27, %v2298_v24 }
  0x58   : > { %v1346_v57 = vadd.f32 %v1318_v63, %v1261_v44  ;;  %v987_v63 = vmul.f32 %v1795_v11, %v1848_v33  ;;  %v1348_v17 = vadd.f32 %v1320_v43, %v1263_v37  ;;  %v847_v55 = vadd.f32 %v819_v36, %v759_v14 }
  0x59   : > { %v673_v44 = vadd.f32 %v2269_v3, %v645_v26  ;;  %v1265_v59 = vadd.f32 %v1237_v54, %v1180_v35  ;;  %v1241_v46 = vmul.f32 %v1817_v20, %v1860_v39  ;;  %v1326_v43 = vmul.f32 %v1298_v1, %v1820_v21 }
  0x5a   : > { %1629 = vst.msk [vmem:[%s2356_s30 + $0x18] sm:$0xff] %vm332_vm0, %v1346_v57  ;;  %1631 = vst.msk [vmem:[%s2356_s30 + $0x28] sm:$0xff] %vm332_vm0, %v1348_v17  ;;  %v905_v18 = vmul.f32 %v1128_v51, %v1792_v10  ;;  %v1097_v42 = vadd.f32 %v1069_v25, %v1013_v12  ;;  %v931_v33 = vadd.f32 %v903_v31, %v847_v55  ;;  %v1302_v17 = vld [vmem:[#allocation3 + $0x88] sm:$0xff] }
  0x5b   : > { %v761_v47 = vadd.f32 %v733_v48, %v673_v44  ;;  %v989_v62 = vmul.f32 %v1795_v11, %v1860_v39  ;;  %v1350_v27 = vadd.f32 %v1322_v53, %v1265_v59  ;;  %v1073_v57 = vmul.f32 %v1298_v1, %v1803_v15 }
  0x5c   : > { %v647_v54 = vmul.f32 %v1128_v51, %v1823_v22  ;;  %v735_v56 = vmul.f32 %v2274_v40, %v1860_v39  ;;  %v1182_v38 = vadd.f32 %v1154_v2, %v1097_v42  ;;  %v1015_v7 = vadd.f32 %v987_v63, %v931_v33  ;;  %v1132_v2 = vld [vmem:[#allocation2 + $0x88] sm:$0xff] }
  0x5d   : > { %v849_v19 = vadd.f32 %v821_v6, %v761_v47  ;;  %v1158_v36 = vmul.f32 %v1130_v13, %v1805_v16  ;;  %1633 = vst.msk [vmem:[%s2356_s30 + $0x38] sm:$0xff] %vm332_vm0, %v1350_v27  ;;  %v1243_v25 = vmul.f32 %v1817_v20, %v1872_v45  ;;  %v1328_v37 = vmul.f32 %v1300_v30, %v1820_v21  ;;  %v1304_v27 = vld [vmem:[#allocation3 + $0x98] sm:$0xff] }
  0x5e   : > { %v675_v53 = vadd.f32 %v2269_v3, %v647_v54  ;;  %v823_v4 = vmul.f32 %v1298_v1, %v2298_v24  ;;  %v1267_v51 = vadd.f32 %v1239_v5, %v1182_v38  ;;  %v1099_v31 = vadd.f32 %v1071_v29, %v1015_v7 }
  0x5f   : > { %v933_v8 = vadd.f32 %v905_v18, %v849_v19  ;;  %v907_v39 = vmul.f32 %v1130_v13, %v1792_v10  ;;  %v991_v14 = vmul.f32 %v1795_v11, %v1872_v45  ;;  %v1075_v26 = vmul.f32 %v1300_v30, %v1803_v15 }
  0x60   : > { %v763_v63 = vadd.f32 %v735_v56, %v675_v53  ;;  %v649_v35 = vmul.f32 %v1130_v13, %v1823_v22  ;;  %v1352_v48 = vadd.f32 %v1324_v9, %v1267_v51  ;;  %v1184_v12 = vadd.f32 %v1156_v49, %v1099_v31  ;;  %v1134_v49 = vld [vmem:[#allocation2 + $0x98] sm:$0xff] }
  0x61   : > { %v1017_v55 = vadd.f32 %v989_v62, %v933_v8  ;;  %v737_v5 = vmul.f32 %v2274_v40, %v1872_v45  ;;  %v1160_v1 = vmul.f32 %v1132_v2, %v1805_v16  ;;  %v825_v6 = vmul.f32 %v1300_v30, %v2298_v24 }
  0x62   : > { %v851_v29 = vadd.f32 %v823_v4, %v763_v63  ;;  %v677_v44 = vadd.f32 %v2269_v3, %v649_v35  ;;  %1635 = vst.msk [vmem:[%s2356_s30 + $0x48] sm:$0xff] %vm332_vm0, %v1352_v48  ;;  %v1269_v59 = vadd.f32 %v1241_v46, %v1184_v12  ;;  %v1245_v13 = vmul.f32 %v1817_v20, %v1890_v52  ;;  %v709_v4 = vld [vmem:[%s1778_s23 + $0x98] sm:$0xff] }
  0x63   : > { %v1101_v18 = vadd.f32 %v1073_v57, %v1017_v55  ;;  %v1330_v9 = vmul.f32 %v1302_v17, %v1820_v21  ;;  %v909_v33 = vmul.f32 %v1132_v2, %v1792_v10  ;;  %v993_v47 = vmul.f32 %v1795_v11, %v1890_v52 }
  0x64   : > { %v935_v42 = vadd.f32 %v907_v39, %v851_v29  ;;  %v765_v45 = vadd.f32 %v737_v5, %v677_v44  ;;  %v1354_v62 = vadd.f32 %v1326_v43, %v1269_v59  ;;  %v1077_v46 = vmul.f32 %v1302_v17, %v1803_v15  ;;  %v1591_v59 = vld [vmem:[%s1778_s23 + $0xa8] sm:$0xff] }
  0x65   : > { %v1186_v30 = vadd.f32 %v1158_v36, %v1101_v18  ;;  %v651_v57 = vmul.f32 %v1132_v2, %v1823_v22  ;;  %v1162_v38 = vmul.f32 %v1134_v49, %v1805_v16  ;;  %v739_v7 = vmul.f32 %v2274_v40, %v1890_v52  ;;  %v1136_v2 = vld [vmem:[#allocation2 + $0xa8] sm:$0xff]  ;;  %v1138_v18 = vld [vmem:[#allocation2 + $0xb8] sm:$0xff] }
  0x66   : > { %v1019_v54 = vadd.f32 %v991_v14, %v935_v42  ;;  %v853_v56 = vadd.f32 %v825_v6, %v765_v45  ;;  %1637 = vst.msk [vmem:[%s2356_s30 + $0x58] sm:$0xff] %vm332_vm0, %v1354_v62  ;;  %v1247_v53 = vmul.f32 %v1817_v20, %v1906_v58  ;;  %v827_v36 = vmul.f32 %v1302_v17, %v2298_v24  ;;  %v1306_v52 = vld [vmem:[#allocation3 + $0xa8] sm:$0xff] }
  0x67   : > { %v1271_v19 = vadd.f32 %v1243_v25, %v1186_v30  ;;  %v679_v43 = vadd.f32 %v2269_v3, %v651_v57  ;;  %v1332_v8 = vmul.f32 %v1304_v27, %v1820_v21  ;;  %v911_v39 = vmul.f32 %v1134_v49, %v1792_v10  ;;  %v1619_v30 = vld [vmem:[%s1778_s23 + $0xb8] sm:$0xff] }
  0x68   : > { %v1103_v51 = vadd.f32 %v1075_v26, %v1019_v54  ;;  %v937_v31 = vadd.f32 %v909_v33, %v853_v56  ;;  %v995_v25 = vmul.f32 %v1795_v11, %v1906_v58  ;;  %v1079_v35 = vmul.f32 %v1304_v27, %v1803_v15 }
  0x69   : > { %v1356_v63 = vadd.f32 %v1328_v37, %v1271_v19  ;;  %v767_v14 = vadd.f32 %v739_v7, %v679_v43  ;;  %v653_v12 = vmul.f32 %v1134_v49, %v1823_v22  ;;  %v741_v26 = vmul.f32 %v2274_v40, %v709_v4  ;;  %v1140_v43 = vld [vmem:[#allocation2 + $0xc8] sm:$0xff] }
  0x6a   : > { %v1188_v48 = vadd.f32 %v1160_v1, %v1103_v51  ;;  %v1021_v17 = vadd.f32 %v993_v47, %v937_v31  ;;  %v1164_v5 = vmul.f32 %v1136_v2, %v1805_v16  ;;  %v1249_v37 = vmul.f32 %v1817_v20, %v1921_v0 }
  0x6b   : > { %1639 = vst.msk [vmem:[%s2356_s30 + $0x68] sm:$0xff] %vm332_vm0, %v1356_v63  ;;  %v855_v55 = vadd.f32 %v827_v36, %v767_v14  ;;  %v1334_v29 = vmul.f32 %v1306_v52, %v1820_v21  ;;  %v681_v1 = vadd.f32 %v2269_v3, %v653_v12  ;;  %v829_v6 = vmul.f32 %v1304_v27, %v2298_v24 }
  0x6c   : > { %v1273_v58 = vadd.f32 %v1245_v13, %v1188_v48  ;;  %v1105_v44 = vadd.f32 %v1077_v46, %v1021_v17  ;;  %v913_v42 = vmul.f32 %v1136_v2, %v1792_v10  ;;  %v997_v45 = vmul.f32 %v1591_v59, %v1795_v11  ;;  %v1308_v13 = vld [vmem:[#allocation3 + $0xb8] sm:$0xff]  ;;  %v1621_v17 = vld [vmem:[%s1778_s23 + $0xc8] sm:$0xff] }
  0x6d   : > { %v939_v49 = vadd.f32 %v911_v39, %v855_v55  ;;  %v1081_v33 = vmul.f32 %v1306_v52, %v1803_v15  ;;  %v769_v62 = vadd.f32 %v741_v26, %v681_v1  ;;  %v655_v46 = vmul.f32 %v1136_v2, %v1823_v22  ;;  %v1310_v39 = vld [vmem:[#allocation3 + $0xc8] sm:$0xff] }
  0x6e   : > { %v1358_v47 = vadd.f32 %v1330_v9, %v1273_v58  ;;  %v1190_v0 = vadd.f32 %v1162_v38, %v1105_v44  ;;  %v1166_v27 = vmul.f32 %v1138_v18, %v1805_v16  ;;  %v1251_v54 = vmul.f32 %v1619_v30, %v1817_v20 }
  0x6f   : > { %v1023_v57 = vadd.f32 %v995_v25, %v939_v49  ;;  %v743_v56 = vmul.f32 %v1591_v59, %v2274_v40  ;;  %v857_v19 = vadd.f32 %v829_v6, %v769_v62  ;;  %v683_v9 = vadd.f32 %v2269_v3, %v655_v46  ;;  %v1142_v6 = vld [vmem:[#allocation2 + $0xd8] sm:$0xff] }
  0x70   : > { %1641 = vst.msk [vmem:[%s2356_s30 + $0x78] sm:$0xff] %vm332_vm0, %v1358_v47  ;;  %v1275_v7 = vadd.f32 %v1247_v53, %v1190_v0  ;;  %v831_v38 = vmul.f32 %v1306_v52, %v2298_v24  ;;  %v1336_v4 = vmul.f32 %v1308_v13, %v1820_v21  ;;  %v915_v51 = vmul.f32 %v1138_v18, %v1792_v10  ;;  %v1623_v62 = vld [vmem:[%s1778_s23 + $0xd8] sm:$0xff] }
  0x71   : > { %v1107_v36 = vadd.f32 %v1079_v35, %v1023_v57  ;;  %v999_v31 = vmul.f32 %v1619_v30, %v1795_v11  ;;  %v941_v63 = vadd.f32 %v913_v42, %v857_v19  ;;  %v771_v14 = vadd.f32 %v743_v56, %v683_v9  ;;  %v1144_v9 = vld [vmem:[#allocation2 + $0xe8] sm:$0xff] }
  0x72   : > { %v1360_v2 = vadd.f32 %v1332_v8, %v1275_v7  ;;  %v1083_v53 = vmul.f32 %v1308_v13, %v1803_v15  ;;  %v1168_v48 = vmul.f32 %v1140_v43, %v1805_v16  ;;  %v657_v52 = vmul.f32 %v1138_v18, %v1823_v22 }
  0x73   : > { %v1192_v25 = vadd.f32 %v1164_v5, %v1107_v36  ;;  %v745_v35 = vmul.f32 %v1619_v30, %v2274_v40  ;;  %v1025_v12 = vadd.f32 %v997_v45, %v941_v63  ;;  %v859_v26 = vadd.f32 %v831_v38, %v771_v14  ;;  %v1312_v45 = vld [vmem:[#allocation3 + $0xd8] sm:$0xff]  ;;  %v1314_v63 = vld [vmem:[#allocation3 + $0xe8] sm:$0xff] }
  0x74   : > { %1643 = vst.msk [vmem:[%s2356_s30 + $0x88] sm:$0xff] %vm332_vm0, %v1360_v2  ;;  %v1253_v55 = vmul.f32 %v1621_v17, %v1817_v20  ;;  %v1338_v8 = vmul.f32 %v1310_v39, %v1820_v21  ;;  %v685_v44 = vadd.f32 %v2269_v3, %v657_v52  ;;  %v833_v5 = vmul.f32 %v1308_v13, %v2298_v24 }
  0x75   : > { %v1277_v58 = vadd.f32 %v1249_v37, %v1192_v25  ;;  %v917_v1 = vmul.f32 %v1140_v43, %v1792_v10  ;;  %v1109_v59 = vadd.f32 %v1081_v33, %v1025_v12  ;;  %v943_v18 = vadd.f32 %v915_v51, %v859_v26  ;;  %v2526_v26 = vld [vmem:[#allocation2 + $0xe0] sm:$0xff] }
  0x76   : > { %v1001_v49 = vmul.f32 %v1621_v17, %v1795_v11  ;;  %v1085_v42 = vmul.f32 %v1310_v39, %v1803_v15  ;;  %v773_v0 = vadd.f32 %v745_v35, %v685_v44  ;;  %v659_v37 = vmul.f32 %v1140_v43, %v1823_v22 }
  0x77   : > { %v1362_v47 = vadd.f32 %v1334_v29, %v1277_v58  ;;  %v747_v30 = vmul.f32 %v1621_v17, %v2274_v40  ;;  %v1194_v46 = vadd.f32 %v1166_v27, %v1109_v59  ;;  %v1027_v13 = vadd.f32 %v999_v31, %v943_v18 }
  0x78   : > { %v1170_v57 = vmul.f32 %v1142_v6, %v1805_v16  ;;  %v1255_v56 = vmul.f32 %v1623_v62, %v1817_v20  ;;  %v861_v33 = vadd.f32 %v833_v5, %v773_v0  ;;  %v1340_v7 = vmul.f32 %v1312_v45, %v1820_v21  ;;  %v1146_v5 = vld [vmem:[#allocation2 + $0xf8] sm:$0xff] }
  0x79   : > { %1645 = vst.msk [vmem:[%s2356_s30 + $0x98] sm:$0xff] %vm332_vm0, %v1362_v47  ;;  %v687_v19 = vadd.f32 %v2269_v3, %v659_v37  ;;  %v835_v29 = vmul.f32 %v1310_v39, %v2298_v24  ;;  %v1279_v38 = vadd.f32 %v1251_v54, %v1194_v46  ;;  %v1111_v43 = vadd.f32 %v1083_v53, %v1027_v13  ;;  %v2544_v13 = vld [vmem:[#allocation2 + $0xf0] sm:$0xff] }
  0x7a   : > { %v919_v36 = vmul.f32 %v1142_v6, %v1792_v10  ;;  %v1003_v27 = vmul.f32 %v1623_v62, %v1795_v11  ;;  %v945_v51 = vadd.f32 %v917_v1, %v861_v33  ;;  %v1087_v2 = vmul.f32 %v1312_v45, %v1803_v15 }
  0x7b   : > { %v775_v31 = vadd.f32 %v747_v30, %v687_v19  ;;  %v661_v14 = vmul.f32 %v1142_v6, %v1823_v22  ;;  %v1364_v25 = vadd.f32 %v1336_v4, %v1279_v38  ;;  %v1196_v17 = vadd.f32 %v1168_v48, %v1111_v43 }
  0x7c   : > { %v1172_v52 = vmul.f32 %v1144_v9, %v1805_v16  ;;  %v749_v39 = vmul.f32 %v1623_v62, %v2274_v40  ;;  %v1029_v54 = vadd.f32 %v1001_v49, %v945_v51  ;;  %v837_v12 = vmul.f32 %v1312_v45, %v2298_v24  ;;  %v1316_v49 = vld [vmem:[#allocation3 + $0xf8] sm:$0xff]  ;;  %v2536_v45 = vld [vmem:[#allocation3 + $0xe0] sm:$0xff] }
  0x7d   : > { %v863_v53 = vadd.f32 %v835_v29, %v775_v31  ;;  %v689_v35 = vadd.f32 %v2269_v3, %v661_v14  ;;  %1647 = vst.msk [vmem:[%s2356_s30 + $0xa8] sm:$0xff] %vm332_vm0, %v1364_v25  ;;  %v1281_v58 = vadd.f32 %v1253_v55, %v1196_v17  ;;  %v1257_v44 = vmul.f32 %v1817_v20, %v2124_v61  ;;  %v690_v14 = vld [vmem:[%s1778_s23] sm:$0xff] }
  0x7e   : > { %v1342_v4 = vmul.f32 %v1314_v63, %v1820_v21  ;;  %v921_v48 = vmul.f32 %v1144_v9, %v1792_v10  ;;  %v1113_v1 = vadd.f32 %v1085_v42, %v1029_v54  ;;  %v1005_v18 = vmul.f32 %v1795_v11, %v2124_v61  ;;  %v1657_v61 = vld [vmem:[%s1778_s23 + $0xe8] sm:$0xff]  ;;  %v2561_v54 = vld [vmem:[#allocation3 + $0xf0] sm:$0xff] }
  0x7f   : > { %v947_v6 = vadd.f32 %v919_v36, %v863_v53  ;;  %v777_v59 = vadd.f32 %v749_v39, %v689_v35  ;;  %v1366_v55 = vadd.f32 %v1338_v8, %v1281_v58  ;;  %v1089_v47 = vmul.f32 %v1314_v63, %v1803_v15 }
  0x80   : > { %v1405_v0 = vmul.f32 %v2526_v26, %v1823_v22  ;;  %v1412_v62 = vmul.f32 %v2274_v40, %v2121_v60  ;;  %v1198_v37 = vadd.f32 %v1170_v57, %v1113_v1  ;;  %v1174_v46 = vmul.f32 %v1146_v5, %v1805_v16 }
  0x81   : > { %v1031_v42 = vadd.f32 %v1003_v27, %v947_v6  ;;  %v865_v30 = vadd.f32 %v837_v12, %v777_v59  ;;  %1649 = vst.msk [vmem:[%s2356_s30 + $0xb8] sm:$0xff] %vm332_vm0, %v1366_v55  ;;  %v1259_v8 = vmul.f32 %v1817_v20, %v2237_v23  ;;  %v1344_v33 = vmul.f32 %v1316_v49, %v1820_v21  ;;  %v1572_v59 = vld [vmem:[%s1778_s23 + $0x10] sm:$0xff] }
  0x82   : > { %v1407_v19 = vadd.f32 %v2269_v3, %v1405_v0  ;;  %v1419_v60 = vmul.f32 %v2536_v45, %v2298_v24  ;;  %v1283_v57 = vadd.f32 %v1255_v56, %v1198_v37  ;;  %v1406_v43 = vmul.f32 %v1144_v9, %v1823_v22 }
  0x83   : > { %v1115_v29 = vadd.f32 %v1087_v2, %v1031_v42  ;;  %v949_v38 = vadd.f32 %v921_v48, %v865_v30  ;;  %v1426_v27 = vmul.f32 %v2544_v13, %v1792_v10  ;;  %v1413_v51 = vmul.f32 %v1657_v61, %v2274_v40  ;;  %v1289_v30 = vld [vmem:[#allocation3 + $0x20] sm:$0xff] }
  0x84   : > { %v1414_v36 = vadd.f32 %v1412_v62, %v1407_v19  ;;  %v1420_v31 = vmul.f32 %v1314_v63, %v2298_v24  ;;  %v1368_v25 = vadd.f32 %v1340_v7, %v1283_v57  ;;  %v1408_v56 = vadd.f32 %v2269_v3, %v1406_v43  ;;  %v1121_v43 = vld [vmem:[#allocation2 + $0x30] sm:$0xff] }
  0x85   : > { %v1200_v17 = vadd.f32 %v1172_v52, %v1115_v29  ;;  %v1033_v39 = vadd.f32 %v1005_v18, %v949_v38  ;;  %v1433_v9 = vmul.f32 %v1795_v11, %v2208_v41  ;;  %v1427_v53 = vmul.f32 %v1146_v5, %v1792_v10 }
  0x86   : > { %v1421_v2 = vadd.f32 %v1419_v60, %v1414_v36  ;;  %v634_v35 = vmul.f32 %v1823_v22, %v2282_v28  ;;  %1651 = vst.msk [vmem:[%s2356_s30 + $0xc8] sm:$0xff] %vm332_vm0, %v1368_v25  ;;  %v1415_v52 = vadd.f32 %v1413_v51, %v1408_v56  ;;  %v722_v12 = vmul.f32 %v2274_v40, %v690_v14  ;;  %v1602_v14 = vld [vmem:[%s1778_s23 + $0x30] sm:$0xff] }
  0x87   : > { %v1285_v63 = vadd.f32 %v1257_v44, %v1200_v17  ;;  %v1117_v7 = vadd.f32 %v1089_v47, %v1033_v39  ;;  %v1440_v48 = vmul.f32 %v2561_v54, %v1803_v15  ;;  %v810_v5 = vmul.f32 %v2298_v24, %v2294_v34  ;;  %v1291_v25 = vld [vmem:[#allocation3 + $0x30] sm:$0xff] }
  0x88   : > { %v1428_v58 = vadd.f32 %v1426_v27, %v1421_v2  ;;  %v662_v41 = vadd.f32 %v2269_v3, %v634_v35  ;;  %v1422_v28 = vadd.f32 %v1420_v31, %v1415_v52  ;;  %v1434_v44 = vmul.f32 %v1795_v11, %v2237_v23  ;;  %v1119_v23 = vld [vmem:[#allocation2 + $0x20] sm:$0xff] }
  0x89   : > { %v1370_v1 = vadd.f32 %v1342_v4, %v1285_v63  ;;  %v1202_v6 = vadd.f32 %v1174_v46, %v1117_v7  ;;  %v1441_v55 = vmul.f32 %v1316_v49, %v1803_v15  ;;  %v894_v34 = vmul.f32 %v2308_v32, %v1792_v10 }
  0x8a   : > { %v1435_v18 = vadd.f32 %v1433_v9, %v1428_v58  ;;  %v750_v47 = vadd.f32 %v722_v12, %v662_v41  ;;  %v1429_v62 = vadd.f32 %v1427_v53, %v1422_v28  ;;  %v978_v4 = vmul.f32 %v1572_v59, %v1795_v11  ;;  %v1123_v58 = vld [vmem:[#allocation2 + $0x40] sm:$0xff] }
  0x8b   : > { %1653 = vst.msk [vmem:[%s2356_s30 + $0xd8] sm:$0xff] %vm332_vm0, %v1370_v1  ;;  %v1287_v0 = vadd.f32 %v1259_v8, %v1202_v6  ;;  %v636_v46 = vmul.f32 %v1823_v22, %v2308_v32  ;;  %v724_v49 = vmul.f32 %v1572_v59, %v2274_v40  ;;  %v1600_v8 = vld [vmem:[%s1778_s23 + $0x20] sm:$0xff]  ;;  %v1062_v57 = vmul.f32 %v2321_v50, %v1803_v15 }
  0x8c   : > { %v1442_v37 = vadd.f32 %v1440_v48, %v1435_v18  ;;  %v838_v42 = vadd.f32 %v810_v5, %v750_v47  ;;  %v1436_v19 = vadd.f32 %v1434_v44, %v1429_v62  ;;  %v812_v38 = vmul.f32 %v2298_v24, %v2321_v50  ;;  %v1604_v18 = vld [vmem:[%s1778_s23 + $0x40] sm:$0xff] }
  0x8d   : > { %v1372_v61 = vadd.f32 %v1344_v33, %v1287_v0  ;;  %v664_v29 = vadd.f32 %v2269_v3, %v636_v46  ;;  %v1147_v33 = vmul.f32 %v1119_v23, %v1805_v16  ;;  %v1232_v36 = vmul.f32 %v1600_v8, %v1817_v20 }
  0x8e   : > { %1660 = vst.msk [vmem:[%s2356_s30 + $0xf0] sm:$0xff] %vm332_vm0, %v1442_v37  ;;  %v922_v60 = vadd.f32 %v894_v34, %v838_v42  ;;  %v1443_v32 = vadd.f32 %v1441_v55, %v1436_v19  ;;  %v1317_v27 = vmul.f32 %v1289_v30, %v1820_v21  ;;  %v638_v17 = vmul.f32 %v1119_v23, %v1823_v22  ;;  %v1293_v37 = vld [vmem:[#allocation3 + $0x40] sm:$0xff] }
  0x8f   : > { %1655 = vst.msk [vmem:[%s2356_s30 + $0xe8] sm:$0xff] %vm332_vm0, %v1372_v61  ;;  %v752_v31 = vadd.f32 %v724_v49, %v664_v29  ;;  %v726_v39 = vmul.f32 %v1600_v8, %v2274_v40  ;;  %v896_v50 = vmul.f32 %v1119_v23, %v1792_v10  ;;  %v980_v56 = vmul.f32 %v1600_v8, %v1795_v11  ;;  %v1125_v8 = vld [vmem:[#allocation2 + $0x50] sm:$0xff] }
  0x90   : > { %v1006_v51 = vadd.f32 %v978_v4, %v922_v60  ;;  %1661 = vst.msk [vmem:[%s2356_s30 + $0xf8] sm:$0xff] %vm332_vm0, %v1443_v32  ;;  %v1064_v2 = vmul.f32 %v1289_v30, %v1803_v15  ;;  %v1149_v9 = vmul.f32 %v1121_v43, %v1805_v16  ;;  %v666_v63 = vadd.f32 %v2269_v3, %v638_v17  ;;  %v1295_v17 = vld [vmem:[#allocation3 + $0x50] sm:$0xff] }
  0x91   : > { %v840_v35 = vadd.f32 %v812_v38, %v752_v31  ;;  %v814_v7 = vmul.f32 %v1289_v30, %v2298_v24  ;;  %v1234_v52 = vmul.f32 %v1602_v14, %v1817_v20  ;;  %v1319_v12 = vmul.f32 %v1291_v25, %v1820_v21 }
  0x92   : > { %v1090_v53 = vadd.f32 %v1062_v57, %v1006_v51  ;;  %v640_v48 = vmul.f32 %v1121_v43, %v1823_v22  ;;  %v728_v41 = vmul.f32 %v1602_v14, %v2274_v40  ;;  %v754_v6 = vadd.f32 %v726_v39, %v666_v63  ;;  %v1606_v51 = vld [vmem:[%s1778_s23 + $0x50] sm:$0xff] }
  0x93   : > { %v924_v1 = vadd.f32 %v896_v50, %v840_v35  ;;  %v898_v28 = vmul.f32 %v1121_v43, %v1792_v10  ;;  %v982_v44 = vmul.f32 %v1602_v14, %v1795_v11  ;;  %v1066_v59 = vmul.f32 %v1291_v25, %v1803_v15 }
  0x94   : > { %v1175_v5 = vadd.f32 %v1147_v33, %v1090_v53  ;;  %v668_v55 = vadd.f32 %v2269_v3, %v640_v48  ;;  %v816_v47 = vmul.f32 %v1291_v25, %v2298_v24  ;;  %v842_v34 = vadd.f32 %v814_v7, %v754_v6  ;;  %v1127_v7 = vld [vmem:[#allocation2 + $0x60] sm:$0xff] }
  0x95   : > { %v1008_v62 = vadd.f32 %v980_v56, %v924_v1  ;;  %v1151_v4 = vmul.f32 %v1123_v58, %v1805_v16  ;;  %v1236_v42 = vmul.f32 %v1604_v18, %v1817_v20  ;;  %v900_v30 = vmul.f32 %v1123_v58, %v1792_v10 }
  0x96   : > { %v1260_v0 = vadd.f32 %v1232_v36, %v1175_v5  ;;  %v756_v23 = vadd.f32 %v728_v41, %v668_v55  ;;  %v642_v46 = vmul.f32 %v1123_v58, %v1823_v22  ;;  %v926_v19 = vadd.f32 %v898_v28, %v842_v34 }
  0x97   : > { %v1092_v61 = vadd.f32 %v1064_v2, %v1008_v62  ;;  %v730_v60 = vmul.f32 %v1604_v18, %v2274_v40  ;;  %v984_v29 = vmul.f32 %v1604_v18, %v1795_v11  ;;  %v818_v43 = vmul.f32 %v1293_v37, %v2298_v24 }
  0x98   : > { %v1345_v49 = vadd.f32 %v1317_v27, %v1260_v0  ;;  %v844_v57 = vadd.f32 %v816_v47, %v756_v23  ;;  %v670_v38 = vadd.f32 %v2269_v3, %v642_v46  ;;  %v1010_v33 = vadd.f32 %v982_v44, %v926_v19  ;;  %v1297_v47 = vld [vmem:[#allocation3 + $0x60] sm:$0xff]  ;;  %v1129_v19 = vld [vmem:[#allocation2 + $0x70] sm:$0xff] }
  0x99   : > { %v1177_v32 = vadd.f32 %v1149_v9, %v1092_v61  ;;  %v1321_v36 = vmul.f32 %v1293_v37, %v1820_v21  ;;  %v1068_v27 = vmul.f32 %v1293_v37, %v1803_v15  ;;  %v1153_v14 = vmul.f32 %v1125_v8, %v1805_v16 }
  0x9a   : > { %1628 = vst.msk [vmem:[%s2356_s30 + $0x10] sm:$0xff] %vm332_vm0, %v1345_v49  ;;  %v928_v31 = vadd.f32 %v900_v30, %v844_v57  ;;  %v1238_v25 = vmul.f32 %v1606_v51, %v1817_v20  ;;  %v758_v39 = vadd.f32 %v730_v60, %v670_v38  ;;  %v1094_v56 = vadd.f32 %v1066_v59, %v1010_v33  ;;  %v1608_v59 = vld [vmem:[%s1778_s23 + $0x60] sm:$0xff] }
  0x9b   : > { %v1262_v50 = vadd.f32 %v1234_v52, %v1177_v32  ;;  %v902_v2 = vmul.f32 %v1125_v8, %v1792_v10  ;;  %v644_v9 = vmul.f32 %v1125_v8, %v1823_v22  ;;  %v986_v63 = vmul.f32 %v1606_v51, %v1795_v11  ;;  %v1610_v8 = vld [vmem:[%s1778_s23 + $0x70] sm:$0xff] }
  0x9c   : > { %v1012_v53 = vadd.f32 %v984_v29, %v928_v31  ;;  %v846_v35 = vadd.f32 %v818_v43, %v758_v39  ;;  %v732_v58 = vmul.f32 %v1606_v51, %v2274_v40  ;;  %v1179_v41 = vadd.f32 %v1151_v4, %v1094_v56  ;;  %v1131_v56 = vld [vmem:[#allocation2 + $0x80] sm:$0xff] }
  0x9d   : > { %v1347_v48 = vadd.f32 %v1319_v12, %v1262_v50  ;;  %v672_v5 = vadd.f32 %v2269_v3, %v644_v9  ;;  %v820_v52 = vmul.f32 %v1295_v17, %v2298_v24  ;;  %v1323_v6 = vmul.f32 %v1295_v17, %v1820_v21 }
  0x9e   : > { %v1096_v1 = vadd.f32 %v1068_v27, %v1012_v53  ;;  %v930_v28 = vadd.f32 %v902_v2, %v846_v35  ;;  %v1070_v44 = vmul.f32 %v1295_v17, %v1803_v15  ;;  %v1264_v18 = vadd.f32 %v1236_v42, %v1179_v41  ;;  %v1612_v53 = vld [vmem:[%s1778_s23 + $0x80] sm:$0xff] }
  0x9f   : > { %1630 = vst.msk [vmem:[%s2356_s30 + $0x20] sm:$0xff] %vm332_vm0, %v1347_v48  ;;  %v1155_v55 = vmul.f32 %v1127_v7, %v1805_v16  ;;  %v1240_v12 = vmul.f32 %v1608_v59, %v1817_v20  ;;  %v760_v0 = vadd.f32 %v732_v58, %v672_v5  ;;  %v904_v4 = vmul.f32 %v1127_v7, %v1792_v10  ;;  %v2674_v35 = vld [vmem:[%s2793_s2] ss:$0 sm:$0xff] }
  0xa0   : > { %v1181_v62 = vadd.f32 %v1153_v14, %v1096_v1  ;;  %v1014_v34 = vadd.f32 %v986_v63, %v930_v28  ;;  %v646_v37 = vmul.f32 %v1127_v7, %v1823_v22  ;;  %v1349_v23 = vadd.f32 %v1321_v36, %v1264_v18  ;;  %v1299_v36 = vld [vmem:[#allocation3 + $0x70] sm:$0xff] }
  0xa1   : > { %v848_v30 = vadd.f32 %v820_v52, %v760_v0  ;;  %v988_v46 = vmul.f32 %v1608_v59, %v1795_v11  ;;  %v734_v42 = vmul.f32 %v1608_v59, %v2274_v40  ;;  %v822_v57 = vmul.f32 %v1297_v47, %v2298_v24  ;;  %v1301_v52 = vld [vmem:[#allocation3 + $0x80] sm:$0xff] }
  0xa2   : > { %v1266_v49 = vadd.f32 %v1238_v25, %v1181_v62  ;;  %v1098_v61 = vadd.f32 %v1070_v44, %v1014_v34  ;;  %v674_v60 = vadd.f32 %v2269_v3, %v646_v37  ;;  %1632 = vst.msk [vmem:[%s2356_s30 + $0x30] sm:$0xff] %vm332_vm0, %v1349_v23  ;;  %v1325_v29 = vmul.f32 %v1297_v47, %v1820_v21  ;;  %v1614_v34 = vld [vmem:[%s1778_s23 + $0x90] sm:$0xff] }
  0xa3   : > { %v932_v38 = vadd.f32 %v904_v4, %v848_v30  ;;  %v1072_v33 = vmul.f32 %v1297_v47, %v1803_v15  ;;  %v1157_v31 = vmul.f32 %v1129_v19, %v1805_v16  ;;  %v648_v14 = vmul.f32 %v1129_v19, %v1823_v22 }
  0xa4   : > { %v1351_v43 = vadd.f32 %v1323_v6, %v1266_v49  ;;  %v1183_v32 = vadd.f32 %v1155_v55, %v1098_v61  ;;  %v762_v27 = vadd.f32 %v734_v42, %v674_v60  ;;  %v736_v3 = vmul.f32 %v1610_v8, %v2274_v40 }
  0xa5   : > { %v1016_v51 = vadd.f32 %v988_v46, %v932_v38  ;;  %v906_v39 = vmul.f32 %v1129_v19, %v1792_v10  ;;  %v990_v50 = vmul.f32 %v1610_v8, %v1795_v11  ;;  %v1242_v9 = vmul.f32 %v1610_v8, %v1817_v20  ;;  %v1303_v8 = vld [vmem:[#allocation3 + $0x90] sm:$0xff]  ;;  %v1135_v38 = vld [vmem:[#allocation2 + $0xa0] sm:$0xff] }
  0xa6   : > { %1634 = vst.msk [vmem:[%s2356_s30 + $0x40] sm:$0xff] %vm332_vm0, %v1351_v43  ;;  %v1268_v25 = vadd.f32 %v1240_v12, %v1183_v32  ;;  %v850_v17 = vadd.f32 %v822_v57, %v762_v27  ;;  %v676_v63 = vadd.f32 %v2674_v35, %v648_v14  ;;  %v824_v7 = vmul.f32 %v1299_v36, %v2298_v24  ;;  %v1133_v12 = vld [vmem:[#allocation2 + $0x90] sm:$0xff] }
  0xa7   : > { %v1100_v2 = vadd.f32 %v1072_v33, %v1016_v51  ;;  %v1327_v48 = vmul.f32 %v1299_v36, %v1820_v21  ;;  %v1074_v5 = vmul.f32 %v1299_v36, %v1803_v15  ;;  %v1159_v6 = vmul.f32 %v1131_v56, %v1805_v16 }
  0xa8   : > { %v1353_v58 = vadd.f32 %v1325_v29, %v1268_v25  ;;  %v934_v41 = vadd.f32 %v906_v39, %v850_v17  ;;  %v764_v28 = vadd.f32 %v736_v3, %v676_v63  ;;  %v650_v44 = vmul.f32 %v1131_v56, %v1823_v22 }
  0xa9   : > { %v1185_v1 = vadd.f32 %v1157_v31, %v1100_v2  ;;  %v908_v18 = vmul.f32 %v1131_v56, %v1792_v10  ;;  %v992_v55 = vmul.f32 %v1612_v53, %v1795_v11  ;;  %v738_v47 = vmul.f32 %v1612_v53, %v2274_v40  ;;  %v1616_v31 = vld [vmem:[%s1778_s23 + $0xa0] sm:$0xff] }
  0xaa   : > { %1636 = vst.msk [vmem:[%s2356_s30 + $0x50] sm:$0xff] %vm332_vm0, %v1353_v58  ;;  %v1018_v59 = vadd.f32 %v990_v50, %v934_v41  ;;  %v852_v62 = vadd.f32 %v824_v7, %v764_v28  ;;  %v678_v4 = vadd.f32 %v2674_v35, %v650_v44  ;;  %v826_v37 = vmul.f32 %v1301_v52, %v2298_v24  ;;  %v1618_v44 = vld [vmem:[%s1778_s23 + $0xb0] sm:$0xff] }
  0xab   : > { %v1270_v0 = vadd.f32 %v1242_v9, %v1185_v1  ;;  %v1244_v30 = vmul.f32 %v1612_v53, %v1817_v20  ;;  %v1329_v46 = vmul.f32 %v1301_v52, %v1820_v21  ;;  %v1076_v42 = vmul.f32 %v1301_v52, %v1803_v15  ;;  %v1305_v9 = vld [vmem:[#allocation3 + $0xa0] sm:$0xff]  ;;  %v1137_v1 = vld [vmem:[#allocation2 + $0xb0] sm:$0xff] }
  0xac   : > { %v1102_v23 = vadd.f32 %v1074_v5, %v1018_v59  ;;  %v936_v61 = vadd.f32 %v908_v18, %v852_v62  ;;  %v1161_v19 = vmul.f32 %v1133_v12, %v1805_v16  ;;  %v766_v60 = vadd.f32 %v738_v47, %v678_v4  ;;  %v1307_v62 = vld [vmem:[#allocation3 + $0xb0] sm:$0xff] }
  0xad   : > { %v1355_v49 = vadd.f32 %v1327_v48, %v1270_v0  ;;  %v1246_v29 = vmul.f32 %v1614_v34, %v1817_v20  ;;  %v652_v43 = vmul.f32 %v1133_v12, %v1823_v22  ;;  %v740_v32 = vmul.f32 %v1614_v34, %v2274_v40 }
  0xae   : > { %v1187_v57 = vadd.f32 %v1159_v6, %v1102_v23  ;;  %v1020_v33 = vadd.f32 %v992_v55, %v936_v61  ;;  %v854_v36 = vadd.f32 %v826_v37, %v766_v60  ;;  %v910_v27 = vmul.f32 %v1133_v12, %v1792_v10  ;;  %v1620_v60 = vld [vmem:[%s1778_s23 + $0xc0] sm:$0xff] }
  0xaf   : > { %1638 = vst.msk [vmem:[%s2356_s30 + $0x60] sm:$0xff] %vm332_vm0, %v1355_v49  ;;  %v994_v51 = vmul.f32 %v1614_v34, %v1795_v11  ;;  %v1331_v3 = vmul.f32 %v1303_v8, %v1820_v21  ;;  %v680_v25 = vadd.f32 %v2674_v35, %v652_v43  ;;  %v828_v17 = vmul.f32 %v1303_v8, %v2298_v24 }
  0xb0   : > { %v1272_v14 = vadd.f32 %v1244_v30, %v1187_v57  ;;  %v1104_v39 = vadd.f32 %v1076_v42, %v1020_v33  ;;  %v938_v50 = vadd.f32 %v910_v27, %v854_v36  ;;  %v1078_v56 = vmul.f32 %v1303_v8, %v1803_v15  ;;  %v1139_v8 = vld [vmem:[#allocation2 + $0xc0] sm:$0xff] }
  0xb1   : > { %v1163_v2 = vmul.f32 %v1135_v38, %v1805_v16  ;;  %v768_v63 = vadd.f32 %v740_v32, %v680_v25  ;;  %v654_v7 = vmul.f32 %v1135_v38, %v1823_v22  ;;  %v742_v58 = vmul.f32 %v1616_v31, %v2274_v40 }
  0xb2   : > { %v1357_v53 = vadd.f32 %v1329_v46, %v1272_v14  ;;  %v1189_v48 = vadd.f32 %v1161_v19, %v1104_v39  ;;  %v1022_v41 = vadd.f32 %v994_v51, %v938_v50  ;;  %v1248_v5 = vmul.f32 %v1616_v31, %v1817_v20 }
  0xb3   : > { %v912_v52 = vmul.f32 %v1135_v38, %v1792_v10  ;;  %v856_v6 = vadd.f32 %v828_v17, %v768_v63  ;;  %v996_v28 = vmul.f32 %v1616_v31, %v1795_v11  ;;  %v682_v59 = vadd.f32 %v2674_v35, %v654_v7  ;;  %v1309_v31 = vld [vmem:[#allocation3 + $0xc0] sm:$0xff] }
  0xb4   : > { %1640 = vst.msk [vmem:[%s2356_s30 + $0x70] sm:$0xff] %vm332_vm0, %v1357_v53  ;;  %v830_v18 = vmul.f32 %v1305_v9, %v2298_v24  ;;  %v1274_v55 = vadd.f32 %v1246_v29, %v1189_v48  ;;  %v1106_v12 = vadd.f32 %v1078_v56, %v1022_v41  ;;  %v1333_v47 = vmul.f32 %v1305_v9, %v1820_v21  ;;  %v1141_v53 = vld [vmem:[#allocation2 + $0xd0] sm:$0xff] }
  0xb5   : > { %v1080_v0 = vmul.f32 %v1305_v9, %v1803_v15  ;;  %v940_v34 = vadd.f32 %v912_v52, %v856_v6  ;;  %v770_v4 = vadd.f32 %v742_v58, %v682_v59  ;;  %v914_v37 = vmul.f32 %v1137_v1, %v1792_v10  ;;  %v1622_v58 = vld [vmem:[%s1778_s23 + $0xd0] sm:$0xff] }
  0xb6   : > { %v656_v23 = vmul.f32 %v1137_v1, %v1823_v22  ;;  %v1359_v30 = vadd.f32 %v1331_v3, %v1274_v55  ;;  %v1191_v46 = vadd.f32 %v1163_v2, %v1106_v12  ;;  %v998_v42 = vmul.f32 %v1618_v44, %v1795_v11 }
  0xb7   : > { %v744_v49 = vmul.f32 %v1618_v44, %v2274_v40  ;;  %v1024_v61 = vadd.f32 %v996_v28, %v940_v34  ;;  %v858_v19 = vadd.f32 %v830_v18, %v770_v4  ;;  %v832_v29 = vmul.f32 %v1307_v62, %v2298_v24  ;;  %v1311_v28 = vld [vmem:[#allocation3 + $0xd0] sm:$0xff] }
  0xb8   : > { %v684_v57 = vadd.f32 %v2674_v35, %v656_v23  ;;  %1642 = vst.msk [vmem:[%s2356_s30 + $0x80] sm:$0xff] %vm332_vm0, %v1359_v30  ;;  %v1276_v38 = vadd.f32 %v1248_v5, %v1191_v46  ;;  %v1165_v43 = vmul.f32 %v1137_v1, %v1805_v16  ;;  %v1250_v32 = vmul.f32 %v1618_v44, %v1817_v20 }
  0xb9   : > { %v1335_v33 = vmul.f32 %v1307_v62, %v1820_v21  ;;  %v1108_v36 = vadd.f32 %v1080_v0, %v1024_v61  ;;  %v942_v27 = vadd.f32 %v914_v37, %v858_v19  ;;  %v1082_v51 = vmul.f32 %v1307_v62, %v1803_v15 }
  0xba   : > { %v772_v14 = vadd.f32 %v744_v49, %v684_v57  ;;  %v1361_v3 = vadd.f32 %v1333_v47, %v1276_v38  ;;  %v916_v25 = vmul.f32 %v1139_v8, %v1792_v10  ;;  %v658_v17 = vmul.f32 %v1139_v8, %v1823_v22  ;;  %v1624_v49 = vld [vmem:[%s1778_s23 + $0xe0] sm:$0xff] }
  0xbb   : > { %v746_v39 = vmul.f32 %v1620_v60, %v2274_v40  ;;  %v1193_v50 = vadd.f32 %v1165_v43, %v1108_v36  ;;  %v1026_v56 = vadd.f32 %v998_v42, %v942_v27  ;;  %v1000_v9 = vmul.f32 %v1620_v60, %v1795_v11 }
  0xbc   : > { %v860_v2 = vadd.f32 %v832_v29, %v772_v14  ;;  %1644 = vst.msk [vmem:[%s2356_s30 + $0x90] sm:$0xff] %vm332_vm0, %v1361_v3  ;;  %v1167_v63 = vmul.f32 %v1139_v8, %v1805_v16  ;;  %v1252_v7 = vmul.f32 %v1620_v60, %v1817_v20  ;;  %v686_v48 = vadd.f32 %v2674_v35, %v658_v17 }
  0xbd   : > { %v834_v41 = vmul.f32 %v1309_v31, %v2298_v24  ;;  %v1278_v5 = vadd.f32 %v1250_v32, %v1193_v50  ;;  %v1110_v52 = vadd.f32 %v1082_v51, %v1026_v56  ;;  %v1337_v1 = vmul.f32 %v1309_v31, %v1820_v21 }
  0xbe   : > { %v944_v6 = vadd.f32 %v916_v25, %v860_v2  ;;  %v1084_v44 = vmul.f32 %v1309_v31, %v1803_v15  ;;  %v774_v59 = vadd.f32 %v746_v39, %v686_v48  ;;  %v918_v18 = vmul.f32 %v1141_v53, %v1792_v10  ;;  %v1626_v31 = vld [vmem:[%s1778_s23 + $0xf0] sm:$0xff] }
  0xbf   : > { %v660_v55 = vmul.f32 %v1141_v53, %v1823_v22  ;;  %v1363_v12 = vadd.f32 %v1335_v33, %v1278_v5  ;;  %v1195_v47 = vadd.f32 %v1167_v63, %v1110_v52  ;;  %v748_v62 = vmul.f32 %v1622_v58, %v2274_v40 }
  0xc0   : > { %v1028_v0 = vadd.f32 %v1000_v9, %v944_v6  ;;  %v862_v34 = vadd.f32 %v834_v41, %v774_v59  ;;  %v1002_v4 = vmul.f32 %v1622_v58, %v1795_v11  ;;  %v836_v23 = vmul.f32 %v1311_v28, %v2298_v24 }
  0xc1   : > { %v688_v37 = vadd.f32 %v2674_v35, %v660_v55  ;;  %1646 = vst.msk [vmem:[%s2356_s30 + $0xa0] sm:$0xff] %vm332_vm0, %v1363_v12  ;;  %v1280_v30 = vadd.f32 %v1252_v7, %v1195_v47  ;;  %v1169_v42 = vmul.f32 %v1141_v53, %v1805_v16  ;;  %v1254_v22 = vmul.f32 %v1622_v58, %v1817_v20 }
  0xc2   : > { %v1112_v46 = vadd.f32 %v1084_v44, %v1028_v0  ;;  %v946_v61 = vadd.f32 %v918_v18, %v862_v34  ;;  %v920_v40 = vmul.f32 %v2526_v26, %v1792_v10  ;;  %v1086_v24 = vmul.f32 %v1311_v28, %v1803_v15 }
  0xc3   : > { %v776_v19 = vadd.f32 %v748_v62, %v688_v37  ;;  %v1365_v8 = vadd.f32 %v1337_v1, %v1280_v30  ;;  %v1004_v29 = vmul.f32 %v1624_v49, %v1795_v11  ;;  %v1339_v43 = vmul.f32 %v1311_v28, %v1820_v21 }
  0xc4   : > { %v1197_v35 = vadd.f32 %v1169_v42, %v1112_v46  ;;  %v1030_v60 = vadd.f32 %v1002_v4, %v946_v61  ;;  %v1171_v32 = vmul.f32 %v2526_v26, %v1805_v16  ;;  %v1256_v10 = vmul.f32 %v1624_v49, %v1817_v20 }
  0xc5   : > { %v864_v57 = vadd.f32 %v836_v23, %v776_v19  ;;  %1648 = vst.msk [vmem:[%s2356_s30 + $0xb0] sm:$0xff] %vm332_vm0, %v1365_v8  ;;  %v1088_v27 = vmul.f32 %v2536_v45, %v1803_v15  ;;  %v1173_v3 = vmul.f32 %v2544_v13, %v1805_v16  ;;  %v1341_v26 = vmul.f32 %v2536_v45, %v1820_v21 }
  0xc6   : > { %v1282_v38 = vadd.f32 %v1254_v22, %v1197_v35  ;;  %v1114_v33 = vadd.f32 %v1086_v24, %v1030_v60  ;;  %v1258_v39 = vmul.f32 %v1626_v31, %v1817_v20  ;;  %v1343_v15 = vmul.f32 %v2561_v54, %v1820_v21 }
  0xc7   : > { %v948_v36 = vadd.f32 %v920_v40, %v864_v57 }
  0xc8   : > { %v1367_v51 = vadd.f32 %v1339_v43, %v1282_v38  ;;  %v1199_v11 = vadd.f32 %v1171_v32, %v1114_v33 }
  0xc9   : > { %v1032_v14 = vadd.f32 %v1004_v29, %v948_v36 }
  0xca   : > { %1650 = vst.msk [vmem:[%s2356_s30 + $0xc0] sm:$0xff] %vm332_vm0, %v1367_v51  ;;  %v1284_v25 = vadd.f32 %v1256_v10, %v1199_v11 }
  0xcb   : > { %v1116_v17 = vadd.f32 %v1088_v27, %v1032_v14 }
  0xcc   : > { %v1369_v50 = vadd.f32 %v1341_v26, %v1284_v25 }
  0xcd   : > { %v1201_v56 = vadd.f32 %v1173_v3, %v1116_v17 }
  0xce   : > { %1652 = vst.msk [vmem:[%s2356_s30 + $0xd0] sm:$0xff] %vm332_vm0, %v1369_v50 }
  0xcf   : > { %v1286_v2 = vadd.f32 %v1258_v39, %v1201_v56 }
  0xd1   : > { %v1371_v9 = vadd.f32 %v1343_v15, %v1286_v2 }
  0xd3   : > { %1654 = vst.msk [vmem:[%s2356_s30 + $0xe0] sm:$0xff] %vm332_vm0, %v1371_v9 }
  0xd4 PF: > { %s13_s14 = sadd.s32 1, %s1714_s14   ;;  %s2807_s12 = smov %s1710_s13 }
  0xd5   : > { %p10_p5 = scmp.ge.s32.totalorder %s13_s14, 4   ;;  %s2808_s13 = smov %s2810_s15 }
  0xd7   :  { %12 = sbr.rel (!%p10_p5) target bundleno = 2 (0x2), region = 82 }

</bundles_post_ra>
